<compile_context>
chip_gen: v7x
topology: tpu7x:2x2x1
jax: 0.10.0
libtpu: 0.0.40
codegen_flags: <defaults>
</compile_context>

<pallas_src>
import jax
import jax.numpy as jnp
from jax.experimental import pallas as pl
from jax.experimental.pallas import tpu as pltpu


# ----------------------------------------------------------------------------
# Pallas kernels
# ----------------------------------------------------------------------------
def _conv_mm_kernel(p_ref, w_ref, b_ref, o_ref):
    """o = relu(w @ p + b).

    p: (K_pad, M) im2col patches (lane-dense along M = B*oh*ow)
    w: (OC_pad, K_pad) padded conv weights
    b: (OC_pad, 1) bias (broadcast over lanes)
    o: (OC_pad, M)
    """
    acc = jnp.dot(w_ref[...], p_ref[...], preferred_element_type=jnp.float32)
    acc = acc + b_ref[...]
    o_ref[...] = jnp.maximum(acc, 0.0).astype(o_ref.dtype)


def conv_mm_bias_relu(patches, w, b):
    kp, m = patches.shape
    ocp = w.shape[0]
    return pl.pallas_call(
        _conv_mm_kernel,
        out_shape=jax.ShapeDtypeStruct((ocp, m), jnp.float32),
        grid=(1,),
        in_specs=[
            pl.BlockSpec((kp, m), lambda i: (0, 0)),
            pl.BlockSpec((ocp, kp), lambda i: (0, 0)),
            pl.BlockSpec((ocp, 1), lambda i: (0, 0)),
        ],
        out_specs=pl.BlockSpec((ocp, m), lambda i: (0, 0)),
        compiler_params=pltpu.CompilerParams(dimension_semantics=("arbitrary",)),
    )(patches, w, b)


def _fc_fused_kernel(x_ref, w1_ref, b1_ref, w2_ref, b2_ref, w3_ref, b3_ref, o_ref):
    """All three FC layers fused; intermediates never leave VMEM/vregs."""
    h = jnp.dot(x_ref[...], w1_ref[...], preferred_element_type=jnp.float32)
    h = jnp.maximum(h + b1_ref[...], 0.0)
    h = jnp.dot(h, w2_ref[...], preferred_element_type=jnp.float32)
    h = jnp.maximum(h + b2_ref[...], 0.0)
    h = jnp.dot(h, w3_ref[...], preferred_element_type=jnp.float32) + b3_ref[...]
    o_ref[...] = h.astype(o_ref.dtype)


def fc_fused(x, w1, b1, w2, b2, w3, b3):
    bsz, k = x.shape
    n = w3.shape[1]

    def full(shape):
        return pl.BlockSpec(shape, lambda i: (0,) * len(shape))

    return pl.pallas_call(
        _fc_fused_kernel,
        out_shape=jax.ShapeDtypeStruct((bsz, n), jnp.float32),
        grid=(1,),
        in_specs=[full(x.shape), full(w1.shape), full(b1.shape),
                  full(w2.shape), full(b2.shape), full(w3.shape), full(b3.shape)],
        out_specs=full((bsz, n)),
        compiler_params=pltpu.CompilerParams(dimension_semantics=("arbitrary",)),
    )(x, w1, b1, w2, b2, w3, b3)


# ----------------------------------------------------------------------------
# Plain-JAX glue (layout only; XLA fuses these tiny ops)
# ----------------------------------------------------------------------------
def _im2col_km(x, kh, kw):
    """x: (C, B, H, W) -> (C*kh*kw, B*oh*ow).

    K index ordered (c, dy, dx) to match PyTorch's weight.reshape(OC, IC*KH*KW).
    M index ordered (b, y, x).
    """
    c, b, h, w = x.shape
    oh, ow = h - kh + 1, w - kw + 1
    cols = [x[:, :, dy:dy + oh, dx:dx + ow] for dy in range(kh) for dx in range(kw)]
    p = jnp.stack(cols, axis=1)                      # (C, kh*kw, B, oh, ow)
    return p.reshape(c * kh * kw, b * oh * ow)


def _maxpool2x2(x):
    """2x2/stride-2 max pool over the last two dims (H, W even)."""
    return jnp.maximum(
        jnp.maximum(x[..., 0::2, 0::2], x[..., 0::2, 1::2]),
        jnp.maximum(x[..., 1::2, 0::2], x[..., 1::2, 1::2]),
    )


# ----------------------------------------------------------------------------
# Parameters (PyTorch-default-style uniform init) + one-time padded prep
# ----------------------------------------------------------------------------
def init_params(key):
    def uniform(k, shape, fan_in):
        bound = 1.0 / jnp.sqrt(jnp.float32(fan_in))
        return jax.random.uniform(k, shape, jnp.float32, -bound, bound)

    ks = jax.random.split(key, 10)
    return {
        "conv1_w": uniform(ks[0], (6, 3, 5, 5), 3 * 5 * 5),
        "conv1_b": uniform(ks[1], (6,), 3 * 5 * 5),
        "conv2_w": uniform(ks[2], (16, 6, 5, 5), 6 * 5 * 5),
        "conv2_b": uniform(ks[3], (16,), 6 * 5 * 5),
        "fc1_w": uniform(ks[4], (120, 16 * 5 * 5), 16 * 5 * 5),
        "fc1_b": uniform(ks[5], (120,), 16 * 5 * 5),
        "fc2_w": uniform(ks[6], (84, 120), 120),
        "fc2_b": uniform(ks[7], (84,), 120),
        "fc3_w": uniform(ks[8], (10, 84), 84),
        "fc3_b": uniform(ks[9], (10,), 84),
    }


C1_K, C1_KP, C1_OC, C1_OCP = 75, 128, 6, 8      # conv1: K 75->128, OC 6->8
C2_K, C2_KP, C2_OC = 150, 256, 16               # conv2: K 150->256, OC 16 ok
FC_PAD = 128                                    # FC widths padded to 128 lanes


def prepare_params(params):
    """Pad / pre-transpose all weights ONCE so the jitted forward has zero
    per-step weight reshapes/transposes on the critical path."""
    w1 = jnp.zeros((C1_OCP, C1_KP), jnp.float32)
    w1 = w1.at[:C1_OC, :C1_K].set(params["conv1_w"].reshape(C1_OC, C1_K))
    b1 = jnp.zeros((C1_OCP, 1), jnp.float32).at[:C1_OC, 0].set(params["conv1_b"])

    w2 = jnp.zeros((C2_OC, C2_KP), jnp.float32)
    w2 = w2.at[:, :C2_K].set(params["conv2_w"].reshape(C2_OC, C2_K))
    b2 = params["conv2_b"].reshape(C2_OC, 1)

    fw1 = jnp.zeros((400, FC_PAD), jnp.float32).at[:, :120].set(params["fc1_w"].T)
    fb1 = jnp.zeros((1, FC_PAD), jnp.float32).at[0, :120].set(params["fc1_b"])
    fw2 = jnp.zeros((FC_PAD, FC_PAD), jnp.float32).at[:120, :84].set(params["fc2_w"].T)
    fb2 = jnp.zeros((1, FC_PAD), jnp.float32).at[0, :84].set(params["fc2_b"])
    fw3 = jnp.zeros((FC_PAD, FC_PAD), jnp.float32).at[:84, :10].set(params["fc3_w"].T)
    fb3 = jnp.zeros((1, FC_PAD), jnp.float32).at[0, :10].set(params["fc3_b"])

    return {"c1_w": w1, "c1_b": b1, "c2_w": w2, "c2_b": b2,
            "fc1_w": fw1, "fc1_b": fb1, "fc2_w": fw2, "fc2_b": fb2,
            "fc3_w": fw3, "fc3_b": fb3}


# ----------------------------------------------------------------------------
# Forward pass (mirrors SimpleCNN.forward)
# ----------------------------------------------------------------------------
@jax.jit
def simple_cnn_forward(prep, x):
    b = x.shape[0]

    # conv1 + ReLU (Pallas; lane-dense transposed output) ----------------------
    xc = x.transpose(1, 0, 2, 3)                              # (3, B, 32, 32)
    p1 = _im2col_km(xc, 5, 5)                                 # (75, B*784)
    p1 = jnp.pad(p1, ((0, C1_KP - C1_K), (0, 0)))             # K 75 -> 128
    h1 = conv_mm_bias_relu(p1, prep["c1_w"], prep["c1_b"])    # (8, B*784)
    h1 = h1[:C1_OC].reshape(C1_OC, b, 28, 28)                 # (6, B, 28, 28)

    # maxpool 2x2 (plain-JAX glue; review: dedicated Pallas call was overhead) --
    h1 = _maxpool2x2(h1)                                      # (6, B, 14, 14)

    # conv2 + ReLU --------------------------------------------------------------
    p2 = _im2col_km(h1, 5, 5)                                 # (150, B*100)
    p2 = jnp.pad(p2, ((0, C2_KP - C2_K), (0, 0)))             # K 150 -> 256
    h2 = conv_mm_bias_relu(p2, prep["c2_w"], prep["c2_b"])    # (16, B*100)
    h2 = h2.reshape(C2_OC, b, 10, 10)

    # maxpool + flatten (matches PyTorch x.view(-1, 16*5*5) channel-major order)
    h2 = _maxpool2x2(h2)                                      # (16, B, 5, 5)
    flat = h2.transpose(1, 0, 2, 3).reshape(b, 16 * 5 * 5)    # (B, 400)

    # fc1 -> ReLU -> fc2 -> ReLU -> fc3, single fused Pallas kernel -------------
    logits = fc_fused(flat,
                      prep["fc1_w"], prep["fc1_b"],
                      prep["fc2_w"], prep["fc2_b"],
                      prep["fc3_w"], prep["fc3_b"])           # (B, 128) lane-dense
    return logits[:, :10]


# ----------------------------------------------------------------------------
# Pure-JAX reference (for a correctness spot-check)
# ----------------------------------------------------------------------------
def reference_forward(params, x):
    def conv(x, w, b):
        y = jax.lax.conv_general_dilated(
            x, w, window_strides=(1, 1), padding="VALID",
            dimension_numbers=("NCHW", "OIHW", "NCHW"))
        return jax.nn.relu(y + b.reshape(1, -1, 1, 1))

    def pool(x):
        return jax.lax.reduce_window(
            x, -jnp.inf, jax.lax.max, (1, 1, 2, 2), (1, 1, 2, 2), "VALID")

    x = pool(conv(x, params["conv1_w"], params["conv1_b"]))
    x = pool(conv(x, params["conv2_w"], params["conv2_b"]))
    x = x.reshape(x.shape[0], -1)
    x = jax.nn.relu(x @ params["fc1_w"].T + params["fc1_b"])
    x = jax.nn.relu(x @ params["fc2_w"].T + params["fc2_b"])
    return x @ params["fc3_w"].T + params["fc3_b"]


if __name__ == "__main__":
    key = jax.random.PRNGKey(0)
    pkey, xkey = jax.random.split(key)
    params = init_params(pkey)
    prep = prepare_params(params)          # one-time padded/pre-transposed weights
    x = jax.random.normal(xkey, (2, 3, 32, 32), dtype=jnp.float32)

    out = simple_cnn_forward(prep, x)
    out = jax.block_until_ready(out)

    assert out.shape == (2, 10), out.shape
    assert out.dtype == jnp.float32

    ref = reference_forward(params, x)
    max_err = float(jnp.max(jnp.abs(out - ref)))
    assert jnp.allclose(out, ref, atol=1e-3, rtol=1e-3), max_err

    print("KERNEL_OK")
</pallas_src>

<mosaic_0001>
module attributes {stable_mosaic.version = 11 : i64} {
  func.func @_conv_mm_kernel(%arg0: i32, %arg1: memref<128x1568xf32, #tpu.memory_space<vmem>>, %arg2: memref<8x128xf32, #tpu.memory_space<vmem>>, %arg3: memref<8x1xf32, #tpu.memory_space<vmem>>, %arg4: memref<8x1568xf32, #tpu.memory_space<vmem>>) attributes {dimension_semantics = [#tpu.dimension_semantics<arbitrary>], iteration_bounds = array<i64: 1>, scalar_prefetch = 0 : i64, scratch_operands = 0 : i64, tpu.core_type = #tpu.core_type<tc>, window_params = [{pipeline_mode = #tpu.pipeline_mode<synchronous>, transform_indices = @transform_0, window_bounds = array<i64: 128, 1568>}, {pipeline_mode = #tpu.pipeline_mode<synchronous>, transform_indices = @transform_1, window_bounds = array<i64: 8, 128>}, {pipeline_mode = #tpu.pipeline_mode<synchronous>, transform_indices = @transform_2, window_bounds = array<i64: 8, 1>}, {pipeline_mode = #tpu.pipeline_mode<synchronous>, transform_indices = @transform_3, window_bounds = array<i64: 8, 1568>}]} {
    %c0 = arith.constant 0 : index
    %c0_0 = arith.constant 0 : index
    %0 = vector.load %arg2[%c0, %c0_0] : memref<8x128xf32, #tpu.memory_space<vmem>>, vector<8x128xf32>
    %c0_1 = arith.constant 0 : index
    %c0_2 = arith.constant 0 : index
    %1 = vector.load %arg1[%c0_1, %c0_2] : memref<128x1568xf32, #tpu.memory_space<vmem>>, vector<128x1568xf32>
    %cst = arith.constant dense<0.000000e+00> : vector<8x1568xf32>
    %2 = tpu.matmul %0, %1, %cst {dimension_numbers = #tpu.dot_dimension_numbers<[1], [0], [0], [1], [0, 0, 1, 1], [], []>} : vector<8x128xf32>, vector<128x1568xf32>, vector<8x1568xf32> -> vector<8x1568xf32>
    %c0_3 = arith.constant 0 : index
    %c0_4 = arith.constant 0 : index
    %3 = vector.load %arg3[%c0_3, %c0_4] : memref<8x1xf32, #tpu.memory_space<vmem>>, vector<8x1xf32>
    %4 = vector.broadcast %3 : vector<8x1xf32> to vector<8x1568xf32>
    %5 = arith.addf %2, %4 : vector<8x1568xf32>
    %cst_5 = arith.constant 0.000000e+00 : f32
    %6 = vector.broadcast %cst_5 : f32 to vector<8x1568xf32>
    %7 = arith.maximumf %5, %6 : vector<8x1568xf32>
    %c0_6 = arith.constant 0 : index
    %c0_7 = arith.constant 0 : index
    %8 = vector.load %arg4[%c0_6, %c0_7] : memref<8x1568xf32, #tpu.memory_space<vmem>>, vector<8x1568xf32>
    tpu.vector_store %arg4[%c0_6, %c0_7], %7 {strides = array<i32>} : memref<8x1568xf32, #tpu.memory_space<vmem>>, vector<8x1568xf32>,
    return
  }
  func.func @transform_0(%arg0: i32) -> (i32, i32) {
    %c0_i32 = arith.constant 0 : i32
    %c0_i32_0 = arith.constant 0 : i32
    %c0_i32_1 = arith.constant 0 : i32
    return %c0_i32, %c0_i32_0 : i32, i32
  }
  func.func @transform_1(%arg0: i32) -> (i32, i32) {
    %c0_i32 = arith.constant 0 : i32
    %c0_i32_0 = arith.constant 0 : i32
    %c0_i32_1 = arith.constant 0 : i32
    return %c0_i32, %c0_i32_0 : i32, i32
  }
  func.func @transform_2(%arg0: i32) -> (i32, i32) {
    %c0_i32 = arith.constant 0 : i32
    %c0_i32_0 = arith.constant 0 : i32
    %c0_i32_1 = arith.constant 0 : i32
    return %c0_i32, %c0_i32_0 : i32, i32
  }
  func.func @transform_3(%arg0: i32) -> (i32, i32) {
    %c0_i32 = arith.constant 0 : i32
    %c0_i32_0 = arith.constant 0 : i32
    %c0_i32_1 = arith.constant 0 : i32
    return %c0_i32, %c0_i32_0 : i32, i32
  }
}

module attributes {stable_mosaic.version = 11 : i64} {
  func.func @_conv_mm_kernel(%arg0: i32, %arg1: memref<256x200xf32, #tpu.memory_space<vmem>>, %arg2: memref<16x256xf32, #tpu.memory_space<vmem>>, %arg3: memref<16x1xf32, #tpu.memory_space<vmem>>, %arg4: memref<16x200xf32, #tpu.memory_space<vmem>>) attributes {dimension_semantics = [#tpu.dimension_semantics<arbitrary>], iteration_bounds = array<i64: 1>, scalar_prefetch = 0 : i64, scratch_operands = 0 : i64, tpu.core_type = #tpu.core_type<tc>, window_params = [{pipeline_mode = #tpu.pipeline_mode<synchronous>, transform_indices = @transform_0, window_bounds = array<i64: 256, 200>}, {pipeline_mode = #tpu.pipeline_mode<synchronous>, transform_indices = @transform_1, window_bounds = array<i64: 16, 256>}, {pipeline_mode = #tpu.pipeline_mode<synchronous>, transform_indices = @transform_2, window_bounds = array<i64: 16, 1>}, {pipeline_mode = #tpu.pipeline_mode<synchronous>, transform_indices = @transform_3, window_bounds = array<i64: 16, 200>}]} {
    %c0 = arith.constant 0 : index
    %c0_0 = arith.constant 0 : index
    %0 = vector.load %arg2[%c0, %c0_0] : memref<16x256xf32, #tpu.memory_space<vmem>>, vector<16x256xf32>
    %c0_1 = arith.constant 0 : index
    %c0_2 = arith.constant 0 : index
    %1 = vector.load %arg1[%c0_1, %c0_2] : memref<256x200xf32, #tpu.memory_space<vmem>>, vector<256x200xf32>
    %cst = arith.constant dense<0.000000e+00> : vector<16x200xf32>
    %2 = tpu.matmul %0, %1, %cst {dimension_numbers = #tpu.dot_dimension_numbers<[1], [0], [0], [1], [0, 0, 1, 1], [], []>} : vector<16x256xf32>, vector<256x200xf32>, vector<16x200xf32> -> vector<16x200xf32>
    %c0_3 = arith.constant 0 : index
    %c0_4 = arith.constant 0 : index
    %3 = vector.load %arg3[%c0_3, %c0_4] : memref<16x1xf32, #tpu.memory_space<vmem>>, vector<16x1xf32>
    %4 = vector.broadcast %3 : vector<16x1xf32> to vector<16x200xf32>
    %5 = arith.addf %2, %4 : vector<16x200xf32>
    %cst_5 = arith.constant 0.000000e+00 : f32
    %6 = vector.broadcast %cst_5 : f32 to vector<16x200xf32>
    %7 = arith.maximumf %5, %6 : vector<16x200xf32>
    %c0_6 = arith.constant 0 : index
    %c0_7 = arith.constant 0 : index
    %8 = vector.load %arg4[%c0_6, %c0_7] : memref<16x200xf32, #tpu.memory_space<vmem>>, vector<16x200xf32>
    tpu.vector_store %arg4[%c0_6, %c0_7], %7 {strides = array<i32>} : memref<16x200xf32, #tpu.memory_space<vmem>>, vector<16x200xf32>,
    return
  }
  func.func @transform_0(%arg0: i32) -> (i32, i32) {
    %c0_i32 = arith.constant 0 : i32
    %c0_i32_0 = arith.constant 0 : i32
    %c0_i32_1 = arith.constant 0 : i32
    return %c0_i32, %c0_i32_0 : i32, i32
  }
  func.func @transform_1(%arg0: i32) -> (i32, i32) {
    %c0_i32 = arith.constant 0 : i32
    %c0_i32_0 = arith.constant 0 : i32
    %c0_i32_1 = arith.constant 0 : i32
    return %c0_i32, %c0_i32_0 : i32, i32
  }
  func.func @transform_2(%arg0: i32) -> (i32, i32) {
    %c0_i32 = arith.constant 0 : i32
    %c0_i32_0 = arith.constant 0 : i32
    %c0_i32_1 = arith.constant 0 : i32
    return %c0_i32, %c0_i32_0 : i32, i32
  }
  func.func @transform_3(%arg0: i32) -> (i32, i32) {
    %c0_i32 = arith.constant 0 : i32
    %c0_i32_0 = arith.constant 0 : i32
    %c0_i32_1 = arith.constant 0 : i32
    return %c0_i32, %c0_i32_0 : i32, i32
  }
}

module attributes {stable_mosaic.version = 11 : i64} {
  func.func @_fc_fused_kernel(%arg0: i32, %arg1: memref<2x400xf32, #tpu.memory_space<vmem>>, %arg2: memref<400x128xf32, #tpu.memory_space<vmem>>, %arg3: memref<1x128xf32, #tpu.memory_space<vmem>>, %arg4: memref<128x128xf32, #tpu.memory_space<vmem>>, %arg5: memref<1x128xf32, #tpu.memory_space<vmem>>, %arg6: memref<128x128xf32, #tpu.memory_space<vmem>>, %arg7: memref<1x128xf32, #tpu.memory_space<vmem>>, %arg8: memref<2x128xf32, #tpu.memory_space<vmem>>) attributes {dimension_semantics = [#tpu.dimension_semantics<arbitrary>], iteration_bounds = array<i64: 1>, scalar_prefetch = 0 : i64, scratch_operands = 0 : i64, tpu.core_type = #tpu.core_type<tc>, window_params = [{pipeline_mode = #tpu.pipeline_mode<synchronous>, transform_indices = @transform_0, window_bounds = array<i64: 2, 400>}, {pipeline_mode = #tpu.pipeline_mode<synchronous>, transform_indices = @transform_1, window_bounds = array<i64: 400, 128>}, {pipeline_mode = #tpu.pipeline_mode<synchronous>, transform_indices = @transform_2, window_bounds = array<i64: 1, 128>}, {pipeline_mode = #tpu.pipeline_mode<synchronous>, transform_indices = @transform_3, window_bounds = array<i64: 128, 128>}, {pipeline_mode = #tpu.pipeline_mode<synchronous>, transform_indices = @transform_4, window_bounds = array<i64: 1, 128>}, {pipeline_mode = #tpu.pipeline_mode<synchronous>, transform_indices = @transform_5, window_bounds = array<i64: 128, 128>}, {pipeline_mode = #tpu.pipeline_mode<synchronous>, transform_indices = @transform_6, window_bounds = array<i64: 1, 128>}, {pipeline_mode = #tpu.pipeline_mode<synchronous>, transform_indices = @transform_7, window_bounds = array<i64: 2, 128>}]} {
    %c0 = arith.constant 0 : index
    %c0_0 = arith.constant 0 : index
    %0 = vector.load %arg1[%c0, %c0_0] : memref<2x400xf32, #tpu.memory_space<vmem>>, vector<2x400xf32>
    %c0_1 = arith.constant 0 : index
    %c0_2 = arith.constant 0 : index
    %1 = vector.load %arg2[%c0_1, %c0_2] : memref<400x128xf32, #tpu.memory_space<vmem>>, vector<400x128xf32>
    %cst = arith.constant dense<0.000000e+00> : vector<2x128xf32>
    %2 = tpu.matmul %0, %1, %cst {dimension_numbers = #tpu.dot_dimension_numbers<[1], [0], [0], [1], [0, 0, 1, 1], [], []>} : vector<2x400xf32>, vector<400x128xf32>, vector<2x128xf32> -> vector<2x128xf32>
    %c0_3 = arith.constant 0 : index
    %c0_4 = arith.constant 0 : index
    %3 = vector.load %arg3[%c0_3, %c0_4] : memref<1x128xf32, #tpu.memory_space<vmem>>, vector<1x128xf32>
    %4 = vector.broadcast %3 : vector<1x128xf32> to vector<2x128xf32>
    %5 = arith.addf %2, %4 : vector<2x128xf32>
    %cst_5 = arith.constant 0.000000e+00 : f32
    %6 = vector.broadcast %cst_5 : f32 to vector<2x128xf32>
    %7 = arith.maximumf %5, %6 : vector<2x128xf32>
    %c0_6 = arith.constant 0 : index
    %c0_7 = arith.constant 0 : index
    %8 = vector.load %arg4[%c0_6, %c0_7] : memref<128x128xf32, #tpu.memory_space<vmem>>, vector<128x128xf32>
    %cst_8 = arith.constant dense<0.000000e+00> : vector<2x128xf32>
    %9 = tpu.matmul %7, %8, %cst_8 {dimension_numbers = #tpu.dot_dimension_numbers<[1], [0], [0], [1], [0, 0, 1, 1], [], []>} : vector<2x128xf32>, vector<128x128xf32>, vector<2x128xf32> -> vector<2x128xf32>
    %c0_9 = arith.constant 0 : index
    %c0_10 = arith.constant 0 : index
    %10 = vector.load %arg5[%c0_9, %c0_10] : memref<1x128xf32, #tpu.memory_space<vmem>>, vector<1x128xf32>
    %11 = vector.broadcast %10 : vector<1x128xf32> to vector<2x128xf32>
    %12 = arith.addf %9, %11 : vector<2x128xf32>
    %cst_11 = arith.constant 0.000000e+00 : f32
    %13 = vector.broadcast %cst_11 : f32 to vector<2x128xf32>
    %14 = arith.maximumf %12, %13 : vector<2x128xf32>
    %c0_12 = arith.constant 0 : index
    %c0_13 = arith.constant 0 : index
    %15 = vector.load %arg6[%c0_12, %c0_13] : memref<128x128xf32, #tpu.memory_space<vmem>>, vector<128x128xf32>
    %cst_14 = arith.constant dense<0.000000e+00> : vector<2x128xf32>
    %16 = tpu.matmul %14, %15, %cst_14 {dimension_numbers = #tpu.dot_dimension_numbers<[1], [0], [0], [1], [0, 0, 1, 1], [], []>} : vector<2x128xf32>, vector<128x128xf32>, vector<2x128xf32> -> vector<2x128xf32>
    %c0_15 = arith.constant 0 : index
    %c0_16 = arith.constant 0 : index
    %17 = vector.load %arg7[%c0_15, %c0_16] : memref<1x128xf32, #tpu.memory_space<vmem>>, vector<1x128xf32>
    %18 = vector.broadcast %17 : vector<1x128xf32> to vector<2x128xf32>
    %19 = arith.addf %16, %18 : vector<2x128xf32>
    %c0_17 = arith.constant 0 : index
    %c0_18 = arith.constant 0 : index
    %20 = vector.load %arg8[%c0_17, %c0_18] : memref<2x128xf32, #tpu.memory_space<vmem>>, vector<2x128xf32>
    tpu.vector_store %arg8[%c0_17, %c0_18], %19 {strides = array<i32>} : memref<2x128xf32, #tpu.memory_space<vmem>>, vector<2x128xf32>,
    return
  }
  func.func @transform_0(%arg0: i32) -> (i32, i32) {
    %c0_i32 = arith.constant 0 : i32
    %c0_i32_0 = arith.constant 0 : i32
    %c0_i32_1 = arith.constant 0 : i32
    return %c0_i32, %c0_i32_0 : i32, i32
  }
  func.func @transform_1(%arg0: i32) -> (i32, i32) {
    %c0_i32 = arith.constant 0 : i32
    %c0_i32_0 = arith.constant 0 : i32
    %c0_i32_1 = arith.constant 0 : i32
    return %c0_i32, %c0_i32_0 : i32, i32
  }
  func.func @transform_2(%arg0: i32) -> (i32, i32) {
    %c0_i32 = arith.constant 0 : i32
    %c0_i32_0 = arith.constant 0 : i32
    %c0_i32_1 = arith.constant 0 : i32
    return %c0_i32, %c0_i32_0 : i32, i32
  }
  func.func @transform_3(%arg0: i32) -> (i32, i32) {
    %c0_i32 = arith.constant 0 : i32
    %c0_i32_0 = arith.constant 0 : i32
    %c0_i32_1 = arith.constant 0 : i32
    return %c0_i32, %c0_i32_0 : i32, i32
  }
  func.func @transform_4(%arg0: i32) -> (i32, i32) {
    %c0_i32 = arith.constant 0 : i32
    %c0_i32_0 = arith.constant 0 : i32
    %c0_i32_1 = arith.constant 0 : i32
    return %c0_i32, %c0_i32_0 : i32, i32
  }
  func.func @transform_5(%arg0: i32) -> (i32, i32) {
    %c0_i32 = arith.constant 0 : i32
    %c0_i32_0 = arith.constant 0 : i32
    %c0_i32_1 = arith.constant 0 : i32
    return %c0_i32, %c0_i32_0 : i32, i32
  }
  func.func @transform_6(%arg0: i32) -> (i32, i32) {
    %c0_i32 = arith.constant 0 : i32
    %c0_i32_0 = arith.constant 0 : i32
    %c0_i32_1 = arith.constant 0 : i32
    return %c0_i32, %c0_i32_0 : i32, i32
  }
  func.func @transform_7(%arg0: i32) -> (i32, i32) {
    %c0_i32 = arith.constant 0 : i32
    %c0_i32_0 = arith.constant 0 : i32
    %c0_i32_1 = arith.constant 0 : i32
    return %c0_i32, %c0_i32_0 : i32, i32
  }
}

</mosaic_0001>

<bundles_post_ra>
// kernel: simple_cnn_forward.3
= control target key start
LH: loop header
LB: loop body
LE: loop exit
PB: predicated region body
PF: predicated region fallthrough
CT: control target
= control target key end

     0   :  { %v1029_v3 = vmov 0.0   ;;  %v1030_v8 = vmov 0   ;;  %vm1032_vm0 = vmmov 0   ;;  %vm750_vm1 = vcmask 261120   ;;  %s1738_s0 = inlined_call_operand.vmem [shape: f32[128,1568], index: 0, kind: input, shape index: {}]   ;;  %s1739_s1 = inlined_call_operand.vmem [shape: f32[8,128], index: 1, kind: input, shape index: {}]   ;;  %s1740_s2 = inlined_call_operand.vmem [shape: f32[8,1], index: 2, kind: input, shape index: {}]   ;;  %s1741_s3 = inlined_call_operand.vmem [shape: f32[8,1568], index: 3, kind: output, shape index: {}]  }
   0x1   :  { %v16_v0 = vld [vmem:[%s1738_s0 + $0x8] sm:$0xff]  ;;  %v29_v1 = vld [vmem:[%s1738_s0 + $0x70] sm:$0xff]  ;;  %v15_v2 = vld [vmem:[%s1738_s0] sm:$0xff]  ;;  %293 = vmatprep.mubr.f32.mxu0 %v1029_v3  ;;  %364 = vmatprep.mubr.f32.mxu1 %v1029_v3 }
   0x2   :  { %v808_v4 = vpack.c.bf16 %v29_v1, %v16_v0  ;;  %v28_v5 = vld [vmem:[%s1738_s0 + $0x68] sm:$0xff]  ;;  %v42_v6 = vld [vmem:[%s1738_s0 + $0xd8] sm:$0xff]  ;;  %v55_v7 = vld [vmem:[%s1738_s0 + $0x140] sm:$0xff]  ;;  %1028 = vset.pattern.permute.xlu0 %v1030_v8 }
   0x3   :  { %v810_v9 = vpack.c.bf16 %v28_v5, %v15_v2  ;;  %v812_v10 = vpack.c.bf16 %v55_v7, %v42_v6  ;;  %v41_v11 = vld [vmem:[%s1738_s0 + $0xd0] sm:$0xff]  ;;  %v54_v12 = vld [vmem:[%s1738_s0 + $0x138] sm:$0xff]  ;;  %v68_v13 = vld [vmem:[%s1738_s0 + $0x1a8] sm:$0xff] }
   0x4   :  { %809 = vmatprep.subr.bf16.mxu0 %v808_v4  ;;  %v81_v14 = vld [vmem:[%s1738_s0 + $0x210] sm:$0xff]  ;;  %v814_v15 = vpack.c.bf16 %v54_v12, %v41_v11  ;;  %v67_v17 = vld [vmem:[%s1738_s0 + $0x1a0] sm:$0xff]  ;;  %v80_v18 = vld [vmem:[%s1738_s0 + $0x208] sm:$0xff] }
   0x5   :  { %811 = vmatpush1.bf16.msra.mxu0 %v810_v9  ;;  %v816_v16 = vpack.c.bf16 %v81_v14, %v68_v13  ;;  %v94_v19 = vld [vmem:[%s1738_s0 + $0x278] sm:$0xff]  ;;  %v107_v20 = vld [vmem:[%s1738_s0 + $0x2e0] sm:$0xff]  ;;  %v818_v21 = vpack.c.bf16 %v80_v18, %v67_v17  ;;  %v93_v23 = vld [vmem:[%s1738_s0 + $0x270] sm:$0xff] }
   0x6   :  { %813 = vmatprep.subr.bf16.mxu0 %v812_v10  ;;  %v820_v22 = vpack.c.bf16 %v107_v20, %v94_v19  ;;  %v106_v24 = vld [vmem:[%s1738_s0 + $0x2d8] sm:$0xff]  ;;  %v120_v25 = vld [vmem:[%s1738_s0 + $0x348] sm:$0xff]  ;;  %v133_v26 = vld [vmem:[%s1738_s0 + $0x3b0] sm:$0xff] }
   0x7   :  { %v18_v27 = vld [vmem:[%s1738_s0 + $0x18] sm:$0xff]  ;;  %v31_v28 = vld [vmem:[%s1738_s0 + $0x80] sm:$0xff]  ;;  %v17_v29 = vld [vmem:[%s1738_s0 + $0x10] sm:$0xff]  ;;  %v822_v31 = vpack.c.bf16 %v106_v24, %v93_v23  ;;  %v824_v36 = vpack.c.bf16 %v133_v26, %v120_v25 }
   0x8   :  { %v30_v30 = vld [vmem:[%s1738_s0 + $0x78] sm:$0xff]  ;;  %v119_v32 = vld [vmem:[%s1738_s0 + $0x340] sm:$0xff]  ;;  %v132_v33 = vld [vmem:[%s1738_s0 + $0x3a8] sm:$0xff]  ;;  %v840_v34 = vpack.c.bf16 %v31_v28, %v18_v27 }
   0x9   :  { %815 = vmatpush1.bf16.msra.mxu0 %v814_v15  ;;  %v842_v35 = vpack.c.bf16 %v30_v30, %v17_v29  ;;  %v146_v37 = vld [vmem:[%s1738_s0 + $0x418] sm:$0xff]  ;;  %v159_v38 = vld [vmem:[%s1738_s0 + $0x480] sm:$0xff]  ;;  %v44_v39 = vld [vmem:[%s1738_s0 + $0xe8] sm:$0xff]  ;;  %v826_v45 = vpack.c.bf16 %v132_v33, %v119_v32 }
   0xa   :  { %817 = vmatprep.subr.bf16.mxu0 %v816_v16  ;;  %841 = vmatprep.subr.bf16.mxu1 %v840_v34  ;;  %v57_v40 = vld [vmem:[%s1738_s0 + $0x150] sm:$0xff]  ;;  %v43_v41 = vld [vmem:[%s1738_s0 + $0xe0] sm:$0xff]  ;;  %v56_v42 = vld [vmem:[%s1738_s0 + $0x148] sm:$0xff]  ;;  %v828_v49 = vpack.c.bf16 %v159_v38, %v146_v37 }
   0xb   :  { %843 = vmatpush1.bf16.msra.mxu1 %v842_v35  ;;  %v844_v43 = vpack.c.bf16 %v57_v40, %v44_v39  ;;  %v846_v44 = vpack.c.bf16 %v56_v42, %v43_v41  ;;  %v145_v46 = vld [vmem:[%s1738_s0 + $0x410] sm:$0xff]  ;;  %v70_v47 = vld [vmem:[%s1738_s0 + $0x1b8] sm:$0xff]  ;;  %v83_v48 = vld [vmem:[%s1738_s0 + $0x220] sm:$0xff] }
   0xc   :  { %v158_v50 = vld [vmem:[%s1738_s0 + $0x478] sm:$0xff]  ;;  %v848_v51 = vpack.c.bf16 %v83_v48, %v70_v47  ;;  %v69_v52 = vld [vmem:[%s1738_s0 + $0x1b0] sm:$0xff]  ;;  %v172_v54 = vld [vmem:[%s1738_s0 + $0x4e8] sm:$0xff] }
   0xd   :  { %819 = vmatpush1.bf16.msra.mxu0 %v818_v21  ;;  %845 = vmatprep.subr.bf16.mxu1 %v844_v43  ;;  %v82_v53 = vld [vmem:[%s1738_s0 + $0x218] sm:$0xff]  ;;  %v185_v55 = vld [vmem:[%s1738_s0 + $0x550] sm:$0xff]  ;;  %v96_v57 = vld [vmem:[%s1738_s0 + $0x288] sm:$0xff]  ;;  %v830_v59 = vpack.c.bf16 %v158_v50, %v145_v46 }
   0xe   :  { %821 = vmatprep.subr.bf16.mxu0 %v820_v22  ;;  %v850_v56 = vpack.c.bf16 %v82_v53, %v69_v52  ;;  %v109_v58 = vld [vmem:[%s1738_s0 + $0x2f0] sm:$0xff]  ;;  %v95_v61 = vld [vmem:[%s1738_s0 + $0x280] sm:$0xff]  ;;  %v108_v62 = vld [vmem:[%s1738_s0 + $0x2e8] sm:$0xff]  ;;  %v832_v63 = vpack.c.bf16 %v185_v55, %v172_v54 }
   0xf   :  { %847 = vmatpush1.bf16.msra.mxu1 %v846_v44  ;;  %v852_v60 = vpack.c.bf16 %v109_v58, %v96_v57  ;;  %v171_v0 = vld [vmem:[%s1738_s0 + $0x4e0] sm:$0xff]  ;;  %v184_v1 = vld [vmem:[%s1738_s0 + $0x548] sm:$0xff]  ;;  %v122_v2 = vld [vmem:[%s1738_s0 + $0x358] sm:$0xff]  ;;  %v854_v7 = vpack.c.bf16 %v108_v62, %v95_v61 }
  0x10   :  { %849 = vmatprep.subr.bf16.mxu1 %v848_v51  ;;  %v198_v4 = vld [vmem:[%s1738_s0 + $0x5b8] sm:$0xff]  ;;  %v211_v5 = vld [vmem:[%s1738_s0 + $0x620] sm:$0xff]  ;;  %v834_v8 = vpack.c.bf16 %v184_v1, %v171_v0  ;;  %v197_v9 = vld [vmem:[%s1738_s0 + $0x5b0] sm:$0xff] }
  0x11   :  { %823 = vmatpush1.bf16.msra.mxu0 %v822_v31  ;;  %v135_v6 = vld [vmem:[%s1738_s0 + $0x3c0] sm:$0xff]  ;;  %v121_v11 = vld [vmem:[%s1738_s0 + $0x350] sm:$0xff]  ;;  %v134_v12 = vld [vmem:[%s1738_s0 + $0x3b8] sm:$0xff]  ;;  %v836_v13 = vpack.c.bf16 %v211_v5, %v198_v4 }
  0x12   :  { %825 = vmatprep.subr.bf16.mxu0 %v824_v36  ;;  %v856_v10 = vpack.c.bf16 %v135_v6, %v122_v2  ;;  %v210_v14 = vld [vmem:[%s1738_s0 + $0x618] sm:$0xff]  ;;  %v148_v15 = vld [vmem:[%s1738_s0 + $0x428] sm:$0xff]  ;;  %v161_v16 = vld [vmem:[%s1738_s0 + $0x490] sm:$0xff]  ;;  %v858_v19 = vpack.c.bf16 %v134_v12, %v121_v11 }
  0x13   :  { %851 = vmatpush1.bf16.msra.mxu1 %v850_v56  ;;  %v20_v17 = vld [vmem:[%s1738_s0 + $0x28] sm:$0xff]  ;;  %v33_v18 = vld [vmem:[%s1738_s0 + $0x90] sm:$0xff]  ;;  %v838_v20 = vpack.c.bf16 %v210_v14, %v197_v9  ;;  %v19_v21 = vld [vmem:[%s1738_s0 + $0x20] sm:$0xff]  ;;  %v860_v22 = vpack.c.bf16 %v161_v16, %v148_v15 }
  0x14   :  { %853 = vmatprep.subr.bf16.mxu1 %v852_v60  ;;  %v147_v23 = vld [vmem:[%s1738_s0 + $0x420] sm:$0xff]  ;;  %v160_v24 = vld [vmem:[%s1738_s0 + $0x488] sm:$0xff]  ;;  %v872_v25 = vpack.c.bf16 %v33_v18, %v20_v17  ;;  %v174_v27 = vld [vmem:[%s1738_s0 + $0x4f8] sm:$0xff] }
  0x15   :  { %827 = vmatpush1.bf16.msra.mxu0 %v826_v45  ;;  %v32_v26 = vld [vmem:[%s1738_s0 + $0x88] sm:$0xff]  ;;  %v187_v28 = vld [vmem:[%s1738_s0 + $0x560] sm:$0xff]  ;;  %v46_v29 = vld [vmem:[%s1738_s0 + $0xf8] sm:$0xff]  ;;  %v862_v32 = vpack.c.bf16 %v160_v24, %v147_v23 }
  0x16   :  { %829 = vmatprep.subr.bf16.mxu0 %v828_v49  ;;  %v59_v30 = vld [vmem:[%s1738_s0 + $0x160] sm:$0xff]  ;;  %v874_v33 = vpack.c.bf16 %v32_v26, %v19_v21  ;;  %v45_v34 = vld [vmem:[%s1738_s0 + $0xf0] sm:$0xff]  ;;  %v864_v35 = vpack.c.bf16 %v187_v28, %v174_v27  ;;  %v186_v37 = vld [vmem:[%s1738_s0 + $0x558] sm:$0xff] }
  0x17   :  { %855 = vmatpush1.bf16.msra.mxu1 %v854_v7  ;;  %v1250_v31 = vld [vmem:[%s1739_s1] sm:$0xff]  ;;  %v173_v36 = vld [vmem:[%s1738_s0 + $0x4f0] sm:$0xff]  ;;  %v876_v38 = vpack.c.bf16 %v59_v30, %v46_v29  ;;  %v58_v39 = vld [vmem:[%s1738_s0 + $0x158] sm:$0xff] }
  0x18   :  { %857 = vmatprep.subr.bf16.mxu1 %v856_v10  ;;  %v200_v40 = vld [vmem:[%s1738_s0 + $0x5c8] sm:$0xff]  ;;  %v213_v41 = vld [vmem:[%s1738_s0 + $0x630] sm:$0xff]  ;;  %v866_v44 = vpack.c.bf16 %v186_v37, %v173_v36  ;;  %v878_v45 = vpack.c.bf16 %v58_v39, %v45_v34  ;;  %v71_v46 = vld [vmem:[%s1738_s0 + $0x1c0] sm:$0xff] }
  0x19   :  { %831 = vmatpush1.bf16.msra.mxu0 %v830_v59  ;;  %v72_v42 = vld [vmem:[%s1738_s0 + $0x1c8] sm:$0xff]  ;;  %v85_v43 = vld [vmem:[%s1738_s0 + $0x230] sm:$0xff]  ;;  %v868_v47 = vpack.c.bf16 %v213_v41, %v200_v40  ;;  %v199_v48 = vld [vmem:[%s1738_s0 + $0x5c0] sm:$0xff] }
  0x1a   :  { %833 = vmatprep.subr.bf16.mxu0 %v832_v63  ;;  %v212_v49 = vld [vmem:[%s1738_s0 + $0x628] sm:$0xff]  ;;  %v880_v50 = vpack.c.bf16 %v85_v43, %v72_v42  ;;  %v22_v52 = vld [vmem:[%s1738_s0 + $0x38] sm:$0xff]  ;;  %v35_v53 = vld [vmem:[%s1738_s0 + $0xa0] sm:$0xff] }
  0x1b   :  { %859 = vmatpush1.bf16.msra.mxu1 %v858_v19  ;;  %v84_v51 = vld [vmem:[%s1738_s0 + $0x228] sm:$0xff]  ;;  %v98_v54 = vld [vmem:[%s1738_s0 + $0x298] sm:$0xff]  ;;  %v111_v55 = vld [vmem:[%s1738_s0 + $0x300] sm:$0xff]  ;;  %v870_v56 = vpack.c.bf16 %v212_v49, %v199_v48  ;;  %v904_v59 = vpack.c.bf16 %v35_v53, %v22_v52 }
  0x1c   :  { %861 = vmatprep.subr.bf16.mxu1 %v860_v22  ;;  %v882_v57 = vpack.c.bf16 %v84_v51, %v71_v46  ;;  %v97_v58 = vld [vmem:[%s1738_s0 + $0x290] sm:$0xff]  ;;  %v34_v61 = vld [vmem:[%s1738_s0 + $0x98] sm:$0xff]  ;;  %v884_v62 = vpack.c.bf16 %v111_v55, %v98_v54  ;;  %v48_v0 = vld [vmem:[%s1738_s0 + $0x108] sm:$0xff] }
  0x1d   :  { %835 = vmatpush1.bf16.msra.mxu0 %v834_v8  ;;  %v21_v60 = vld [vmem:[%s1738_s0 + $0x30] sm:$0xff]  ;;  %v110_v63 = vld [vmem:[%s1738_s0 + $0x2f8] sm:$0xff]  ;;  %v124_v2 = vld [vmem:[%s1738_s0 + $0x368] sm:$0xff] }
  0x1e   :  { %837 = vmatprep.subr.bf16.mxu0 %v836_v13  ;;  %v61_v1 = vld [vmem:[%s1738_s0 + $0x170] sm:$0xff]  ;;  %v906_v5 = vpack.c.bf16 %v34_v61, %v21_v60  ;;  %v886_v6 = vpack.c.bf16 %v110_v63, %v97_v58  ;;  %v123_v7 = vld [vmem:[%s1738_s0 + $0x360] sm:$0xff]  ;;  %v60_v10 = vld [vmem:[%s1738_s0 + $0x168] sm:$0xff] }
  0x1f   :  { %863 = vmatpush1.bf16.msra.mxu1 %v862_v32  ;;  %v137_v4 = vld [vmem:[%s1738_s0 + $0x3d0] sm:$0xff]  ;;  %v908_v8 = vpack.c.bf16 %v61_v1, %v48_v0  ;;  %v47_v9 = vld [vmem:[%s1738_s0 + $0x100] sm:$0xff]  ;;  %v136_v12 = vld [vmem:[%s1738_s0 + $0x3c8] sm:$0xff] }
  0x20   :  { %865 = vmatprep.subr.bf16.mxu1 %v864_v35  ;;  %v888_v11 = vpack.c.bf16 %v137_v4, %v124_v2  ;;  %v74_v13 = vld [vmem:[%s1738_s0 + $0x1d8] sm:$0xff]  ;;  %v87_v14 = vld [vmem:[%s1738_s0 + $0x240] sm:$0xff]  ;;  %v910_v17 = vpack.c.bf16 %v60_v10, %v47_v9  ;;  %v890_v18 = vpack.c.bf16 %v136_v12, %v123_v7  ;;  %v149_v19 = vld [vmem:[%s1738_s0 + $0x430] sm:$0xff] }
  0x21   :  { %839 = vmatpush1.bf16.msra.mxu0 %v838_v20  ;;  %v150_v15 = vld [vmem:[%s1738_s0 + $0x438] sm:$0xff]  ;;  %v163_v16 = vld [vmem:[%s1738_s0 + $0x4a0] sm:$0xff]  ;;  %v912_v20 = vpack.c.bf16 %v87_v14, %v74_v13  ;;  %v73_v21 = vld [vmem:[%s1738_s0 + $0x1d0] sm:$0xff] }
  0x22   :  { %873 = vmatprep.subr.bf16.mxu0 %v872_v25  ;;  %v86_v22 = vld [vmem:[%s1738_s0 + $0x238] sm:$0xff]  ;;  %v892_v23 = vpack.c.bf16 %v163_v16, %v150_v15  ;;  %v100_v25 = vld [vmem:[%s1738_s0 + $0x2a8] sm:$0xff]  ;;  %v113_v26 = vld [vmem:[%s1738_s0 + $0x310] sm:$0xff] }
  0x23   :  { %867 = vmatpush1.bf16.msra.mxu1 %v866_v44  ;;  %v162_v24 = vld [vmem:[%s1738_s0 + $0x498] sm:$0xff]  ;;  %v176_v27 = vld [vmem:[%s1738_s0 + $0x508] sm:$0xff]  ;;  %v189_v28 = vld [vmem:[%s1738_s0 + $0x570] sm:$0xff]  ;;  %v914_v29 = vpack.c.bf16 %v86_v22, %v73_v21 }
  0x24   :  { %294 = vmatmul.mubr.f32.vlgmr.msra.gmra.mrb[0].mxu0 %v1250_v31  ;;  %869 = vmatprep.subr.bf16.mxu1 %v868_v47  ;;  %v894_v30 = vpack.c.bf16 %v162_v24, %v149_v19  ;;  %v175_v32 = vld [vmem:[%s1738_s0 + $0x500] sm:$0xff]  ;;  %v112_v35 = vld [vmem:[%s1738_s0 + $0x308] sm:$0xff]  ;;  %v896_v36 = vpack.c.bf16 %v189_v28, %v176_v27  ;;  %v202_v40 = vld [vmem:[%s1738_s0 + $0x5d8] sm:$0xff] }
  0x25   :  { %875 = vmatpush1.bf16.msra.mxu0 %v874_v33  ;;  %435 = vmatprep.mubr.f32.mxu0 %v1029_v3  ;;  %v916_v33 = vpack.c.bf16 %v113_v26, %v100_v25  ;;  %v99_v34 = vld [vmem:[%s1738_s0 + $0x2a0] sm:$0xff]  ;;  %v188_v37 = vld [vmem:[%s1738_s0 + $0x568] sm:$0xff]  ;;  %v201_v44 = vld [vmem:[%s1738_s0 + $0x5d0] sm:$0xff] }
  0x26   :  { %877 = vmatprep.subr.bf16.mxu0 %v876_v38  ;;  %v126_v38 = vld [vmem:[%s1738_s0 + $0x378] sm:$0xff]  ;;  %v139_v39 = vld [vmem:[%s1738_s0 + $0x3e0] sm:$0xff]  ;;  %v918_v42 = vpack.c.bf16 %v112_v35, %v99_v34  ;;  %v898_v43 = vpack.c.bf16 %v188_v37, %v175_v32  ;;  %v125_v46 = vld [vmem:[%s1738_s0 + $0x370] sm:$0xff] }
  0x27   :  { %871 = vmatpush1.bf16.msra.mxu1 %v870_v56  ;;  %v215_v41 = vld [vmem:[%s1738_s0 + $0x640] sm:$0xff]  ;;  %v138_v47 = vld [vmem:[%s1738_s0 + $0x3d8] sm:$0xff]  ;;  %v165_v51 = vld [vmem:[%s1738_s0 + $0x4b0] sm:$0xff] }
  0x28   :  { %905 = vmatprep.subr.bf16.mxu1 %v904_v59  ;;  %v900_v48 = vpack.c.bf16 %v215_v41, %v202_v40  ;;  %v214_v49 = vld [vmem:[%s1738_s0 + $0x638] sm:$0xff]  ;;  %v24_v52 = vld [vmem:[%s1738_s0 + $0x48] sm:$0xff]  ;;  %v37_v53 = vld [vmem:[%s1738_s0 + $0xb0] sm:$0xff]  ;;  %v922_v54 = vpack.c.bf16 %v138_v47, %v125_v46 }
  0x29   :  { %879 = vmatpush1.bf16.msra.mxu0 %v878_v45  ;;  %v920_v45 = vpack.c.bf16 %v139_v39, %v126_v38  ;;  %v902_v55 = vpack.c.bf16 %v214_v49, %v201_v44  ;;  %v23_v56 = vld [vmem:[%s1738_s0 + $0x40] sm:$0xff]  ;;  %v164_v59 = vld [vmem:[%s1738_s0 + $0x4a8] sm:$0xff]  ;;  %v936_v60 = vpack.c.bf16 %v37_v53, %v24_v52  ;;  %v50_v0 = vld [vmem:[%s1738_s0 + $0x118] sm:$0xff] }
  0x2a   :  { %881 = vmatprep.subr.bf16.mxu0 %v880_v50  ;;  %365 = vmatmul.mubr.f32.vlgmr.msra.gmra.mrb[0].mxu1 %v1250_v31  ;;  %v152_v50 = vld [vmem:[%s1738_s0 + $0x448] sm:$0xff]  ;;  %v151_v58 = vld [vmem:[%s1738_s0 + $0x440] sm:$0xff]  ;;  %v49_v2 = vld [vmem:[%s1738_s0 + $0x110] sm:$0xff] }
  0x2b   :  { %907 = vmatpush1.bf16.msra.mxu1 %v906_v5  ;;  %506 = vmatprep.mubr.f32.mxu1 %v1029_v3  ;;  %v36_v61 = vld [vmem:[%s1738_s0 + $0xa8] sm:$0xff]  ;;  %v191_v63 = vld [vmem:[%s1738_s0 + $0x580] sm:$0xff]  ;;  %v926_v4 = vpack.c.bf16 %v164_v59, %v151_v58  ;;  %v190_v9 = vld [vmem:[%s1738_s0 + $0x578] sm:$0xff] }
  0x2c   :  { %909 = vmatprep.subr.bf16.mxu1 %v908_v8  ;;  %v63_v1 = vld [vmem:[%s1738_s0 + $0x180] sm:$0xff]  ;;  %v938_v5 = vpack.c.bf16 %v36_v61, %v23_v56  ;;  %v177_v8 = vld [vmem:[%s1738_s0 + $0x510] sm:$0xff]  ;;  %v76_v14 = vld [vmem:[%s1738_s0 + $0x1e8] sm:$0xff] }
  0x2d   :  { %883 = vmatpush1.bf16.msra.mxu0 %v882_v57  ;;  %v924_v57 = vpack.c.bf16 %v165_v51, %v152_v50  ;;  %v940_v10 = vpack.c.bf16 %v63_v1, %v50_v0  ;;  %v217_v12 = vld [vmem:[%s1738_s0 + $0x650] sm:$0xff]  ;;  %v223_v13 = vld [vmem:[%s1740_s2] sm:$0xff]  ;;  %v930_v16 = vpack.c.bf16 %v190_v9, %v177_v8  ;;  %v216_v21 = vld [vmem:[%s1738_s0 + $0x648] sm:$0xff] }
  0x2e   :  { %885 = vmatprep.subr.bf16.mxu0 %v884_v62  ;;  %v178_v62 = vld [vmem:[%s1738_s0 + $0x518] sm:$0xff]  ;;  %v89_v15 = vld [vmem:[%s1738_s0 + $0x250] sm:$0xff]  ;;  %226 = vperm.xlu0 %1028, %v223_v13   ;;  %v39_v25 = vld [vmem:[%s1738_s0 + $0xc0] sm:$0xff] }
  0x2f   :  { %911 = vmatpush1.bf16.msra.mxu1 %v910_v17  ;;  %v928_v7 = vpack.c.bf16 %v191_v63, %v178_v62  ;;  %v944_v22 = vpack.c.bf16 %v89_v15, %v76_v14  ;;  %v26_v24 = vld [vmem:[%s1738_s0 + $0x58] sm:$0xff]  ;;  %v115_v27 = vld [vmem:[%s1738_s0 + $0x320] sm:$0xff]  ;;  %v52_v37 = vld [vmem:[%s1738_s0 + $0x128] sm:$0xff] }
  0x30   :  { %913 = vmatprep.subr.bf16.mxu1 %v912_v20  ;;  %v203_v20 = vld [vmem:[%s1738_s0 + $0x5e0] sm:$0xff]  ;;  %v102_v26 = vld [vmem:[%s1738_s0 + $0x2b8] sm:$0xff]  ;;  %v968_v32 = vpack.c.bf16 %v39_v25, %v26_v24  ;;  %v65_v38 = vld [vmem:[%s1738_s0 + $0x190] sm:$0xff] }
  0x31   :  { %887 = vmatpush1.bf16.msra.mxu0 %v886_v6  ;;  %v62_v6 = vld [vmem:[%s1738_s0 + $0x178] sm:$0xff]  ;;  %v934_v28 = vpack.c.bf16 %v216_v21, %v203_v20  ;;  %v948_v35 = vpack.c.bf16 %v115_v27, %v102_v26  ;;  %v128_v39 = vld [vmem:[%s1738_s0 + $0x388] sm:$0xff]  ;;  %v141_v40 = vld [vmem:[%s1738_s0 + $0x3f0] sm:$0xff]  ;;  %v972_v44 = vpack.c.bf16 %v65_v38, %v52_v37 }
  0x32   :  { %889 = vmatprep.subr.bf16.mxu0 %v888_v11  ;;  %v204_v11 = vld [vmem:[%s1738_s0 + $0x5e8] sm:$0xff]  ;;  %v942_v17 = vpack.c.bf16 %v62_v6, %v49_v2  ;;  %v38_v34 = vld [vmem:[%s1738_s0 + $0xb8] sm:$0xff]  ;;  %v952_v47 = vpack.c.bf16 %v141_v40, %v128_v39  ;;  %v91_v50 = vld [vmem:[%s1738_s0 + $0x260] sm:$0xff]  ;;  %v1031_v40 = vmov 0.0|0.0  }
  0x33   :  { %915 = vmatpush1.bf16.msra.mxu1 %v914_v29  ;;  %v932_v19 = vpack.c.bf16 %v217_v12, %v204_v11  ;;  %v64_v46 = vld [vmem:[%s1738_s0 + $0x188] sm:$0xff]  ;;  %v78_v49 = vld [vmem:[%s1738_s0 + $0x1f8] sm:$0xff]  ;;  %v167_v52 = vld [vmem:[%s1738_s0 + $0x4c0] sm:$0xff] }
  0x34   :  { %917 = vmatprep.subr.bf16.mxu1 %v916_v33  ;;  %v25_v33 = vld [vmem:[%s1738_s0 + $0x50] sm:$0xff]  ;;  %v154_v51 = vld [vmem:[%s1738_s0 + $0x458] sm:$0xff]  ;;  %v976_v56 = vpack.c.bf16 %v91_v50, %v78_v49  ;;  %v104_v61 = vld [vmem:[%s1738_s0 + $0x2c8] sm:$0xff] }
  0x35   :  { %891 = vmatpush1.bf16.msra.mxu0 %v890_v18  ;;  %v75_v18 = vld [vmem:[%s1738_s0 + $0x1e0] sm:$0xff]  ;;  %v970_v41 = vpack.c.bf16 %v38_v34, %v25_v33  ;;  %v90_v58 = vld [vmem:[%s1738_s0 + $0x258] sm:$0xff]  ;;  %v956_v59 = vpack.c.bf16 %v167_v52, %v154_v51  ;;  %v117_v62 = vld [vmem:[%s1738_s0 + $0x330] sm:$0xff] }
  0x36   :  { %893 = vmatprep.subr.bf16.mxu0 %v892_v23  ;;  %v88_v23 = vld [vmem:[%s1738_s0 + $0x248] sm:$0xff]  ;;  %v193_v0 = vld [vmem:[%s1738_s0 + $0x590] sm:$0xff]  ;;  %v103_v6 = vld [vmem:[%s1738_s0 + $0x2c0] sm:$0xff] }
  0x37   :  { %919 = vmatpush1.bf16.msra.mxu1 %v918_v42  ;;  %v946_v29 = vpack.c.bf16 %v88_v23, %v75_v18  ;;  %v180_v63 = vld [vmem:[%s1738_s0 + $0x528] sm:$0xff]  ;;  %v143_v11 = vld [vmem:[%s1738_s0 + $0x400] sm:$0xff]  ;;  %v206_v12 = vld [vmem:[%s1738_s0 + $0x5f8] sm:$0xff] }
  0x38   :  { %921 = vmatprep.subr.bf16.mxu1 %v920_v45  ;;  %v51_v45 = vld [vmem:[%s1738_s0 + $0x120] sm:$0xff]  ;;  %v960_v8 = vpack.c.bf16 %v193_v0, %v180_v63  ;;  %v192_v9 = vld [vmem:[%s1738_s0 + $0x588] sm:$0xff]  ;;  %v129_v18 = vld [vmem:[%s1738_s0 + $0x390] sm:$0xff] }
  0x39   :  { %895 = vmatpush1.bf16.msra.mxu0 %v894_v30  ;;  %v101_v30 = vld [vmem:[%s1738_s0 + $0x2b0] sm:$0xff]  ;;  %v974_v53 = vpack.c.bf16 %v64_v46, %v51_v45  ;;  %v219_v13 = vld [vmem:[%s1738_s0 + $0x660] sm:$0xff]  ;;  %v218_v21 = vld [vmem:[%s1738_s0 + $0x658] sm:$0xff] }
  0x3a   :  { %897 = vmatprep.subr.bf16.mxu0 %v896_v36  ;;  %v114_v36 = vld [vmem:[%s1738_s0 + $0x318] sm:$0xff]  ;;  %v964_v20 = vpack.c.bf16 %v219_v13, %v206_v12  ;;  %v169_v23 = vld [vmem:[%s1738_s0 + $0x4d0] sm:$0xff]  ;;  %v27_v26 = vld [vmem:[%s1738_s0 + $0x60] sm:$0xff] }
  0x3b   :  { %923 = vmatpush1.bf16.msra.mxu1 %v922_v54  ;;  %v950_v42 = vpack.c.bf16 %v114_v36, %v101_v30  ;;  %v40_v30 = vld [vmem:[%s1738_s0 + $0xc8] sm:$0xff]  ;;  %v195_v33 = vld [vmem:[%s1738_s0 + $0x5a0] sm:$0xff]  ;;  %v53_v36 = vld [vmem:[%s1738_s0 + $0x130] sm:$0xff] }
  0x3c   :  { %925 = vmatprep.subr.bf16.mxu1 %v924_v57  ;;  %v77_v57 = vld [vmem:[%s1738_s0 + $0x1f0] sm:$0xff]  ;;  %v194_v39 = vld [vmem:[%s1738_s0 + $0x598] sm:$0xff]  ;;  %v79_v49 = vld [vmem:[%s1738_s0 + $0x200] sm:$0xff] }
  0x3d   :  { %899 = vmatpush1.bf16.msra.mxu0 %v898_v43  ;;  %v127_v43 = vld [vmem:[%s1738_s0 + $0x380] sm:$0xff]  ;;  %v978_v1 = vpack.c.bf16 %v90_v58, %v77_v57  ;;  %v181_v38 = vld [vmem:[%s1738_s0 + $0x530] sm:$0xff]  ;;  %v92_v50 = vld [vmem:[%s1738_s0 + $0x268] sm:$0xff] }
  0x3e   :  { %901 = vmatprep.subr.bf16.mxu0 %v900_v48  ;;  %v140_v48 = vld [vmem:[%s1738_s0 + $0x3e8] sm:$0xff]  ;;  %v1007_v52 = vpack.c.bf16 %v92_v50, %v79_v49  ;;  %v157_v58 = vld [vmem:[%s1738_s0 + $0x470] sm:$0xff] }
  0x3f   :  { %927 = vmatpush1.bf16.msra.mxu1 %v926_v4  ;;  %v954_v54 = vpack.c.bf16 %v140_v48, %v127_v43  ;;  %v179_v4 = vld [vmem:[%s1738_s0 + $0x520] sm:$0xff]  ;;  %v221_v43 = vld [vmem:[%s1738_s0 + $0x670] sm:$0xff]  ;;  %v220_v48 = vld [vmem:[%s1738_s0 + $0x668] sm:$0xff] }
  0x40   :  { %929 = vmatprep.subr.bf16.mxu1 %v928_v7  ;;  %v116_v7 = vld [vmem:[%s1738_s0 + $0x328] sm:$0xff]  ;;  %v962_v15 = vpack.c.bf16 %v192_v9, %v179_v4  ;;  %v209_v0 = vld [vmem:[%s1738_s0 + $0x610] sm:$0xff] }
  0x41   :  { %903 = vmatpush1.bf16.msra.mxu0 %v902_v55  ;;  %v153_v55 = vld [vmem:[%s1738_s0 + $0x450] sm:$0xff]  ;;  %v982_v14 = vpack.c.bf16 %v116_v7, %v103_v6 }
  0x42   :  { %937 = vmatprep.subr.bf16.mxu0 %v936_v60  ;;  %v166_v60 = vld [vmem:[%s1738_s0 + $0x4b8] sm:$0xff] }
  0x43   :  { %931 = vmatpush1.bf16.msra.mxu1 %v930_v16  ;;  %v958_v2 = vpack.c.bf16 %v166_v60, %v153_v55  ;;  %v205_v16 = vld [vmem:[%s1738_s0 + $0x5f0] sm:$0xff] }
  0x44   :  { %436 = vmatmul.mubr.f32.vlgmr.msra.gmra.mrb[2].mxu0 %v1250_v31  ;;  %933 = vmatprep.subr.bf16.mxu1 %v932_v19  ;;  %v142_v19 = vld [vmem:[%s1738_s0 + $0x3f8] sm:$0xff]  ;;  %v966_v25 = vpack.c.bf16 %v218_v21, %v205_v16 }
  0x45   :  { %939 = vmatpush1.bf16.msra.mxu0 %v938_v5  ;;  %577 = vmatprep.mubr.f32.mxu0 %v1029_v3  ;;  %v980_v5 = vpack.c.bf16 %v117_v62, %v104_v61  ;;  %v986_v24 = vpack.c.bf16 %v142_v19, %v129_v18  ;;  %v183_v61 = vld [vmem:[%s1738_s0 + $0x540] sm:$0xff]  ;;  %v196_v62 = vld [vmem:[%s1738_s0 + $0x5a8] sm:$0xff] }
  0x46   :  { %941 = vmatprep.subr.bf16.mxu0 %v940_v10  ;;  %v130_v10 = vld [vmem:[%s1738_s0 + $0x398] sm:$0xff]  ;;  %v1019_v63 = vpack.c.bf16 %v196_v62, %v183_v61 }
  0x47   :  { %935 = vmatpush1.bf16.msra.mxu1 %v934_v28  ;;  %v155_v28 = vld [vmem:[%s1738_s0 + $0x460] sm:$0xff] }
  0x48   :  { %969 = vmatprep.subr.bf16.mxu1 %v968_v32  ;;  %v182_v32 = vld [vmem:[%s1738_s0 + $0x538] sm:$0xff] }
  0x49   :  { %943 = vmatpush1.bf16.msra.mxu0 %v942_v17  ;;  %v984_v17 = vpack.c.bf16 %v143_v11, %v130_v10  ;;  %v992_v37 = vpack.c.bf16 %v195_v33, %v182_v32 }
  0x4a   :  { %945 = vmatprep.subr.bf16.mxu0 %v944_v22  ;;  %507 = vmatmul.mubr.f32.vlgmr.msra.gmra.mrb[2].mxu1 %v1250_v31  ;;  %v156_v22 = vld [vmem:[%s1738_s0 + $0x468] sm:$0xff] }
  0x4b   :  { %971 = vmatpush1.bf16.msra.mxu1 %v970_v41  ;;  %648 = vmatprep.mubr.f32.mxu1 %v1029_v3  ;;  %v988_v27 = vpack.c.bf16 %v169_v23, %v156_v22  ;;  %v66_v41 = vld [vmem:[%s1738_s0 + $0x198] sm:$0xff] }
  0x4c   :  { %973 = vmatprep.subr.bf16.mxu1 %v972_v44  ;;  %v994_v44 = vpack.c.bf16 %v194_v39, %v181_v38  ;;  %v1004_v45 = vpack.c.bf16 %v66_v41, %v53_v36 }
  0x4d   :  { %947 = vmatpush1.bf16.msra.mxu0 %v946_v29  ;;  %v168_v29 = vld [vmem:[%s1738_s0 + $0x4c8] sm:$0xff] }
  0x4e   :  { %949 = vmatprep.subr.bf16.mxu0 %v948_v35  ;;  %v990_v34 = vpack.c.bf16 %v168_v29, %v155_v28  ;;  %v1001_v35 = vpack.c.bf16 %v40_v30, %v27_v26 }
  0x4f   :  { %975 = vmatpush1.bf16.msra.mxu1 %v974_v53  ;;  %v105_v53 = vld [vmem:[%s1738_s0 + $0x2d0] sm:$0xff] }
  0x50   :  { %977 = vmatprep.subr.bf16.mxu1 %v976_v56  ;;  %v144_v56 = vld [vmem:[%s1738_s0 + $0x408] sm:$0xff] }
  0x51   :  { %951 = vmatpush1.bf16.msra.mxu0 %v950_v42  ;;  %v208_v42 = vld [vmem:[%s1738_s0 + $0x608] sm:$0xff] }
  0x52   :  { %953 = vmatprep.subr.bf16.mxu0 %v952_v47  ;;  %v996_v46 = vpack.c.bf16 %v221_v43, %v208_v42  ;;  %v207_v47 = vld [vmem:[%s1738_s0 + $0x600] sm:$0xff] }
  0x53   :  { %979 = vmatpush1.bf16.msra.mxu1 %v978_v1  ;;  %v998_v51 = vpack.c.bf16 %v220_v48, %v207_v47  ;;  %v222_v1 = vld [vmem:[%s1738_s0 + $0x678] sm:$0xff] }
  0x54   :  { %981 = vmatprep.subr.bf16.mxu1 %v980_v5 }
  0x55   :  { %955 = vmatpush1.bf16.msra.mxu0 %v954_v54  ;;  %v118_v54 = vld [vmem:[%s1738_s0 + $0x338] sm:$0xff] }
  0x56   :  { %957 = vmatprep.subr.bf16.mxu0 %v956_v59  ;;  %v1010_v55 = vpack.c.bf16 %v118_v54, %v105_v53  ;;  %v170_v59 = vld [vmem:[%s1738_s0 + $0x4d8] sm:$0xff] }
  0x57   :  { %983 = vmatpush1.bf16.msra.mxu1 %v982_v14  ;;  %v1016_v60 = vpack.c.bf16 %v170_v59, %v157_v58 }
  0x58   :  { %985 = vmatprep.subr.bf16.mxu1 %v984_v17 }
  0x59   :  { %959 = vmatpush1.bf16.msra.mxu0 %v958_v2  ;;  %v1022_v2 = vpack.c.bf16 %v222_v1, %v209_v0 }
  0x5a   :  { %961 = vmatprep.subr.bf16.mxu0 %v960_v8 }
  0x5b   :  { %987 = vmatpush1.bf16.msra.mxu1 %v986_v24 }
  0x5c   :  { %989 = vmatprep.subr.bf16.mxu1 %v988_v27 }
  0x5d   :  { %963 = vmatpush1.bf16.msra.mxu0 %v962_v15 }
  0x5e   :  { %965 = vmatprep.subr.bf16.mxu0 %v964_v20 }
  0x5f   :  { %991 = vmatpush1.bf16.msra.mxu1 %v990_v34 }
  0x60   :  { %993 = vmatprep.subr.bf16.mxu1 %v992_v37 }
  0x61   :  { %967 = vmatpush1.bf16.msra.mxu0 %v966_v25 }
  0x62   :  { %1000 = vmatprep.subr.bf16.mxu0 %v1031_v40 }
  0x63   :  { %995 = vmatpush1.bf16.msra.mxu1 %v994_v44 }
  0x64   :  { %578 = vmatmul.mubr.f32.vlgmr.msra.gmra.mrb[4].mxu0 %v1250_v31  ;;  %997 = vmatprep.subr.bf16.mxu1 %v996_v46 }
  0x65   :  { %1002 = vmatpush3.bf16.msra.mxu0 %v1001_v35  ;;  %805 = vmatprep.mubr.msk.f32.mxu0 %vm1032_vm0, %v1029_v3  ;;  %v131_v3 = vld [vmem:[%s1738_s0 + $0x3a0] sm:$0xff] }
  0x66   :  { %1003 = vmatprep.subr.bf16.mxu0 %v1031_v40  ;;  %v1013_v57 = vpack.c.bf16 %v144_v56, %v131_v3 }
  0x67   :  { %999 = vmatpush1.bf16.msra.mxu1 %v998_v51 }
  0x69   :  { %1005 = vmatpush3.bf16.msra.mxu0 %v1004_v45 }
  0x6a   :  { %1006 = vmatprep.subr.bf16.mxu0 %v1031_v40  ;;  %649 = vmatmul.mubr.f32.vlgmr.msra.gmra.mrb[4].mxu1 %v1250_v31 }
  0x6d   :  { %1008 = vmatpush3.bf16.msra.mxu0 %v1007_v52 }
  0x6e   :  { %1009 = vmatprep.subr.bf16.mxu0 %v1031_v40 }
  0x71   :  { %1011 = vmatpush3.bf16.msra.mxu0 %v1010_v55 }
  0x72   :  { %1012 = vmatprep.subr.bf16.mxu0 %v1031_v40 }
  0x75   :  { %1014 = vmatpush3.bf16.msra.mxu0 %v1013_v57 }
  0x76   :  { %1015 = vmatprep.subr.bf16.mxu0 %v1031_v40 }
  0x79   :  { %1017 = vmatpush3.bf16.msra.mxu0 %v1016_v60 }
  0x7a   :  { %1018 = vmatprep.subr.bf16.mxu0 %v1031_v40 }
  0x7d   :  { %1020 = vmatpush3.bf16.msra.mxu0 %v1019_v63 }
  0x7e   :  { %1021 = vmatprep.subr.bf16.mxu0 %v1031_v40 }
  0x81   :  { %1023 = vmatpush3.bf16.msra.mxu0 %v1022_v2 }
  0x84   :  { %806 = vmatmul.mubr.f32.vlgmr.msra.gmra.mrb[6].mxu0 %v1250_v31 }
  0xad   :  { %v227_v4 = vpop.permute.xlu0 %226 }
  0xf7   :  { %v295_v5 = vpop.f32.mrb[0].mxu0 }
  0xf8   :  { %v296_v6 = vadd.f32 %v295_v5, %v227_v4  ;;  %v297_v7 = vpop.f32.mrb[1].mxu0 }
  0xf9   :  { %v298_v8 = vadd.f32 %v297_v7, %v227_v4 }
  0xfa   :  { %v725_v9 = vmax.f32 %v296_v6, 0.0 }
  0xfb   :  { %v726_v10 = vmax.f32 %v298_v8, 0.0 }
  0xfc   :  { %738 = vst [vmem:[%s1741_s3] sm:$0xff] %v725_v9 }
  0xfd   :  { %739 = vst [vmem:[%s1741_s3 + $0x8] sm:$0xff] %v726_v10  ;;  %v366_v11 = vpop.f32.mrb[0].mxu1 }
  0xfe   :  { %v367_v12 = vadd.f32 %v366_v11, %v227_v4  ;;  %v368_v13 = vpop.f32.mrb[1].mxu1 }
  0xff   :  { %v369_v14 = vadd.f32 %v368_v13, %v227_v4 }
 0x100   :  { %v727_v31 = vmax.f32 %v367_v12, 0.0 }
 0x101   :  { %v728_v15 = vmax.f32 %v369_v14, 0.0 }
 0x102   :  { %740 = vst [vmem:[%s1741_s3 + $0x10] sm:$0xff] %v727_v31 }
 0x103   :  { %741 = vst [vmem:[%s1741_s3 + $0x18] sm:$0xff] %v728_v15 }
 0x117   :  { %v437_v16 = vpop.f32.mrb[2].mxu0 }
 0x118   :  { %v438_v17 = vadd.f32 %v437_v16, %v227_v4  ;;  %v439_v18 = vpop.f32.mrb[3].mxu0 }
 0x119   :  { %v440_v19 = vadd.f32 %v439_v18, %v227_v4 }
 0x11a   :  { %v729_v20 = vmax.f32 %v438_v17, 0.0 }
 0x11b   :  { %v730_v21 = vmax.f32 %v440_v19, 0.0 }
 0x11c   :  { %742 = vst [vmem:[%s1741_s3 + $0x20] sm:$0xff] %v729_v20 }
 0x11d   :  { %743 = vst [vmem:[%s1741_s3 + $0x28] sm:$0xff] %v730_v21  ;;  %v508_v22 = vpop.f32.mrb[2].mxu1 }
 0x11e   :  { %v509_v23 = vadd.f32 %v508_v22, %v227_v4  ;;  %v510_v24 = vpop.f32.mrb[3].mxu1 }
 0x11f   :  { %v511_v25 = vadd.f32 %v510_v24, %v227_v4 }
 0x120   :  { %v731_v26 = vmax.f32 %v509_v23, 0.0 }
 0x121   :  { %v732_v27 = vmax.f32 %v511_v25, 0.0 }
 0x122   :  { %744 = vst [vmem:[%s1741_s3 + $0x30] sm:$0xff] %v731_v26 }
 0x123   :  { %745 = vst [vmem:[%s1741_s3 + $0x38] sm:$0xff] %v732_v27 }
 0x137   :  { %v579_v28 = vpop.f32.mrb[4].mxu0 }
 0x138   :  { %v580_v29 = vadd.f32 %v579_v28, %v227_v4  ;;  %v581_v30 = vpop.f32.mrb[5].mxu0 }
 0x139   :  { %v582_v32 = vadd.f32 %v581_v30, %v227_v4 }
 0x13a   :  { %v733_v33 = vmax.f32 %v580_v29, 0.0 }
 0x13b   :  { %v734_v34 = vmax.f32 %v582_v32, 0.0 }
 0x13c   :  { %746 = vst [vmem:[%s1741_s3 + $0x40] sm:$0xff] %v733_v33 }
 0x13d   :  { %747 = vst [vmem:[%s1741_s3 + $0x48] sm:$0xff] %v734_v34  ;;  %v650_v35 = vpop.f32.mrb[4].mxu1 }
 0x13e   :  { %v651_v36 = vadd.f32 %v650_v35, %v227_v4  ;;  %v652_v37 = vpop.f32.mrb[5].mxu1 }
 0x13f   :  { %v653_v38 = vadd.f32 %v652_v37, %v227_v4 }
 0x140   :  { %v735_v39 = vmax.f32 %v651_v36, 0.0 }
 0x141   :  { %v736_v40 = vmax.f32 %v653_v38, 0.0 }
 0x142   :  { %748 = vst [vmem:[%s1741_s3 + $0x50] sm:$0xff] %v735_v39 }
 0x143   :  { %749 = vst [vmem:[%s1741_s3 + $0x58] sm:$0xff] %v736_v40 }
 0x157   :  { %v721_v41 = vpop.f32.mrb[6].mxu0 }
 0x158   :  { %v722_v42 = vadd.f32 %v721_v41, %v227_v4  ;;  %v807_v43 = vpop.f32.mrb[7].mxu0 }
 0x15a   :  { %v737_v44 = vmax.f32 %v722_v42, 0.0 }
 0x15c   :  { %751 = vst.msk [vmem:[%s1741_s3 + $0x60] sm:$0xff] %vm750_vm1, %v737_v44 }

// kernel: simple_cnn_forward.4
= control target key start
LH: loop header
LB: loop body
LE: loop exit
PB: predicated region body
PF: predicated region fallthrough
CT: control target
= control target key end

     0   :  { %v282_v3 = vmov 0   ;;  %vm176_vm0 = vcmask 588800   ;;  %s525_s0 = inlined_call_operand.vmem [shape: f32[256,200], index: 0, kind: input, shape index: {}]   ;;  %s526_s1 = inlined_call_operand.vmem [shape: f32[16,256], index: 1, kind: input, shape index: {}]   ;;  %s527_s2 = inlined_call_operand.vmem [shape: f32[16,1], index: 2, kind: input, shape index: {}]   ;;  %s528_s3 = inlined_call_operand.vmem [shape: f32[16,200], index: 3, kind: output, shape index: {}]  }
   0x1   :  { %v19_v0 = vld [vmem:[%s525_s0 + $0x8] sm:$0xff]  ;;  %v21_v1 = vld [vmem:[%s525_s0 + $0x18] sm:$0xff]  ;;  %v18_v2 = vld [vmem:[%s525_s0] sm:$0xff]  ;;  %281 = vset.pattern.permute.xlu0 %v282_v3 }
   0x2   :  { %v184_v4 = vpack.c.bf16 %v21_v1, %v19_v0  ;;  %v20_v5 = vld [vmem:[%s525_s0 + $0x10] sm:$0xff]  ;;  %v23_v6 = vld [vmem:[%s525_s0 + $0x28] sm:$0xff]  ;;  %v25_v7 = vld [vmem:[%s525_s0 + $0x38] sm:$0xff] }
   0x3   :  { %v186_v8 = vpack.c.bf16 %v20_v5, %v18_v2  ;;  %v188_v9 = vpack.c.bf16 %v25_v7, %v23_v6  ;;  %v22_v10 = vld [vmem:[%s525_s0 + $0x20] sm:$0xff]  ;;  %v24_v11 = vld [vmem:[%s525_s0 + $0x30] sm:$0xff]  ;;  %v27_v12 = vld [vmem:[%s525_s0 + $0x48] sm:$0xff] }
   0x4   :  { %185 = vmatprep.subr.bf16.mxu0 %v184_v4  ;;  %248 = vmatprep.subr.bf16.mxu1 %v184_v4  ;;  %v29_v13 = vld [vmem:[%s525_s0 + $0x58] sm:$0xff]  ;;  %v190_v14 = vpack.c.bf16 %v24_v11, %v22_v10  ;;  %v26_v16 = vld [vmem:[%s525_s0 + $0x40] sm:$0xff]  ;;  %v28_v17 = vld [vmem:[%s525_s0 + $0x50] sm:$0xff] }
   0x5   :  { %187 = vmatpush1.bf16.msra.mxu0 %v186_v8  ;;  %264 = vmatpush1.bf16.msra.mxu1 %v186_v8  ;;  %v192_v15 = vpack.c.bf16 %v29_v13, %v27_v12  ;;  %v31_v18 = vld [vmem:[%s525_s0 + $0x68] sm:$0xff]  ;;  %v33_v19 = vld [vmem:[%s525_s0 + $0x78] sm:$0xff]  ;;  %v194_v20 = vpack.c.bf16 %v28_v17, %v26_v16  ;;  %v30_v22 = vld [vmem:[%s525_s0 + $0x60] sm:$0xff] }
   0x6   :  { %189 = vmatprep.subr.bf16.mxu0 %v188_v9  ;;  %249 = vmatprep.subr.bf16.mxu1 %v188_v9  ;;  %v196_v21 = vpack.c.bf16 %v33_v19, %v31_v18  ;;  %v32_v23 = vld [vmem:[%s525_s0 + $0x70] sm:$0xff]  ;;  %v35_v24 = vld [vmem:[%s525_s0 + $0x88] sm:$0xff]  ;;  %v37_v25 = vld [vmem:[%s525_s0 + $0x98] sm:$0xff] }
   0x7   :  { %v198_v26 = vpack.c.bf16 %v32_v23, %v30_v22  ;;  %v200_v27 = vpack.c.bf16 %v37_v25, %v35_v24  ;;  %v34_v28 = vld [vmem:[%s525_s0 + $0x80] sm:$0xff]  ;;  %v36_v29 = vld [vmem:[%s525_s0 + $0x90] sm:$0xff]  ;;  %v39_v30 = vld [vmem:[%s525_s0 + $0xa8] sm:$0xff] }
   0x8   :  { %v41_v31 = vld [vmem:[%s525_s0 + $0xb8] sm:$0xff]  ;;  %v202_v32 = vpack.c.bf16 %v36_v29, %v34_v28  ;;  %v38_v34 = vld [vmem:[%s525_s0 + $0xa0] sm:$0xff]  ;;  %v40_v35 = vld [vmem:[%s525_s0 + $0xb0] sm:$0xff] }
   0x9   :  { %191 = vmatpush1.bf16.msra.mxu0 %v190_v14  ;;  %265 = vmatpush1.bf16.msra.mxu1 %v190_v14  ;;  %v204_v33 = vpack.c.bf16 %v41_v31, %v39_v30  ;;  %v43_v36 = vld [vmem:[%s525_s0 + $0xc8] sm:$0xff]  ;;  %v45_v37 = vld [vmem:[%s525_s0 + $0xd8] sm:$0xff]  ;;  %v206_v38 = vpack.c.bf16 %v40_v35, %v38_v34  ;;  %v42_v39 = vld [vmem:[%s525_s0 + $0xc0] sm:$0xff] }
   0xa   :  { %193 = vmatprep.subr.bf16.mxu0 %v192_v15  ;;  %250 = vmatprep.subr.bf16.mxu1 %v192_v15  ;;  %v208_v40 = vpack.c.bf16 %v45_v37, %v43_v36  ;;  %v44_v41 = vld [vmem:[%s525_s0 + $0xd0] sm:$0xff]  ;;  %v15_v42 = vld [vmem:[%s526_s1 + $0x8] sm:$0xff]  ;;  %v17_v43 = vld [vmem:[%s526_s1 + $0x18] sm:$0xff] }
   0xb   :  { %v47_v44 = vld [vmem:[%s525_s0 + $0xe8] sm:$0xff]  ;;  %v49_v45 = vld [vmem:[%s525_s0 + $0xf8] sm:$0xff]  ;;  %158 = vmatprep.mubr.f32.mxu0 %v15_v42  ;;  %164 = vmatprep.mubr.f32.mxu1 %v17_v43  ;;  %v82_v46 = vld [vmem:[%s527_s2] sm:$0xff]  ;;  %v210_v47 = vpack.c.bf16 %v44_v41, %v42_v39 }
   0xc   :  { %86 = vperm.xlu0 %281, %v82_v46   ;;  %v83_v48 = vld [vmem:[%s527_s2 + $0x8] sm:$0xff]  ;;  %v212_v49 = vpack.c.bf16 %v49_v45, %v47_v44  ;;  %v46_v50 = vld [vmem:[%s525_s0 + $0xe0] sm:$0xff]  ;;  %v48_v51 = vld [vmem:[%s525_s0 + $0xf0] sm:$0xff] }
   0xd   :  { %195 = vmatpush1.bf16.msra.mxu0 %v194_v20  ;;  %266 = vmatpush1.bf16.msra.mxu1 %v194_v20  ;;  %v51_v52 = vld [vmem:[%s525_s0 + $0x108] sm:$0xff]  ;;  %v53_v53 = vld [vmem:[%s525_s0 + $0x118] sm:$0xff]  ;;  %v214_v54 = vpack.c.bf16 %v48_v51, %v46_v50  ;;  %v50_v56 = vld [vmem:[%s525_s0 + $0x100] sm:$0xff] }
   0xe   :  { %197 = vmatprep.subr.bf16.mxu0 %v196_v21  ;;  %251 = vmatprep.subr.bf16.mxu1 %v196_v21  ;;  %v216_v55 = vpack.c.bf16 %v53_v53, %v51_v52  ;;  %v52_v57 = vld [vmem:[%s525_s0 + $0x110] sm:$0xff]  ;;  %v55_v58 = vld [vmem:[%s525_s0 + $0x128] sm:$0xff]  ;;  %v57_v59 = vld [vmem:[%s525_s0 + $0x138] sm:$0xff] }
   0xf   :  { %v218_v60 = vpack.c.bf16 %v52_v57, %v50_v56  ;;  %v220_v61 = vpack.c.bf16 %v57_v59, %v55_v58  ;;  %v54_v62 = vld [vmem:[%s525_s0 + $0x120] sm:$0xff]  ;;  %v56_v63 = vld [vmem:[%s525_s0 + $0x130] sm:$0xff]  ;;  %v59_v0 = vld [vmem:[%s525_s0 + $0x148] sm:$0xff] }
  0x10   :  { %91 = vperm.xlu0 %281, %v83_v48   ;;  %v61_v1 = vld [vmem:[%s525_s0 + $0x158] sm:$0xff]  ;;  %v222_v2 = vpack.c.bf16 %v56_v63, %v54_v62  ;;  %v58_v4 = vld [vmem:[%s525_s0 + $0x140] sm:$0xff]  ;;  %v60_v5 = vld [vmem:[%s525_s0 + $0x150] sm:$0xff] }
  0x11   :  { %199 = vmatpush1.bf16.msra.mxu0 %v198_v26  ;;  %267 = vmatpush1.bf16.msra.mxu1 %v198_v26  ;;  %v224_v3 = vpack.c.bf16 %v61_v1, %v59_v0  ;;  %v63_v6 = vld [vmem:[%s525_s0 + $0x168] sm:$0xff]  ;;  %v65_v7 = vld [vmem:[%s525_s0 + $0x178] sm:$0xff]  ;;  %v226_v8 = vpack.c.bf16 %v60_v5, %v58_v4  ;;  %v62_v10 = vld [vmem:[%s525_s0 + $0x160] sm:$0xff] }
  0x12   :  { %201 = vmatprep.subr.bf16.mxu0 %v200_v27  ;;  %252 = vmatprep.subr.bf16.mxu1 %v200_v27  ;;  %v228_v9 = vpack.c.bf16 %v65_v7, %v63_v6  ;;  %v64_v11 = vld [vmem:[%s525_s0 + $0x170] sm:$0xff]  ;;  %v67_v12 = vld [vmem:[%s525_s0 + $0x188] sm:$0xff]  ;;  %v69_v13 = vld [vmem:[%s525_s0 + $0x198] sm:$0xff] }
  0x13   :  { %v230_v14 = vpack.c.bf16 %v64_v11, %v62_v10  ;;  %v232_v15 = vpack.c.bf16 %v69_v13, %v67_v12  ;;  %v66_v16 = vld [vmem:[%s525_s0 + $0x180] sm:$0xff]  ;;  %v68_v17 = vld [vmem:[%s525_s0 + $0x190] sm:$0xff]  ;;  %v71_v18 = vld [vmem:[%s525_s0 + $0x1a8] sm:$0xff] }
  0x14   :  { %v73_v19 = vld [vmem:[%s525_s0 + $0x1b8] sm:$0xff]  ;;  %v234_v20 = vpack.c.bf16 %v68_v17, %v66_v16  ;;  %v70_v22 = vld [vmem:[%s525_s0 + $0x1a0] sm:$0xff]  ;;  %v72_v23 = vld [vmem:[%s525_s0 + $0x1b0] sm:$0xff] }
  0x15   :  { %203 = vmatpush1.bf16.msra.mxu0 %v202_v32  ;;  %268 = vmatpush1.bf16.msra.mxu1 %v202_v32  ;;  %v236_v21 = vpack.c.bf16 %v73_v19, %v71_v18  ;;  %v75_v24 = vld [vmem:[%s525_s0 + $0x1c8] sm:$0xff]  ;;  %v77_v25 = vld [vmem:[%s525_s0 + $0x1d8] sm:$0xff]  ;;  %v238_v26 = vpack.c.bf16 %v72_v23, %v70_v22  ;;  %v74_v28 = vld [vmem:[%s525_s0 + $0x1c0] sm:$0xff] }
  0x16   :  { %205 = vmatprep.subr.bf16.mxu0 %v204_v33  ;;  %253 = vmatprep.subr.bf16.mxu1 %v204_v33  ;;  %v240_v27 = vpack.c.bf16 %v77_v25, %v75_v24  ;;  %v76_v29 = vld [vmem:[%s525_s0 + $0x1d0] sm:$0xff]  ;;  %v79_v30 = vld [vmem:[%s525_s0 + $0x1e8] sm:$0xff]  ;;  %v81_v31 = vld [vmem:[%s525_s0 + $0x1f8] sm:$0xff] }
  0x17   :  { %v242_v32 = vpack.c.bf16 %v76_v29, %v74_v28  ;;  %v244_v33 = vpack.c.bf16 %v81_v31, %v79_v30  ;;  %v78_v34 = vld [vmem:[%s525_s0 + $0x1e0] sm:$0xff]  ;;  %v80_v35 = vld [vmem:[%s525_s0 + $0x1f0] sm:$0xff] }
  0x18   :  { %v246_v36 = vpack.c.bf16 %v80_v35, %v78_v34  ;;  %v14_v37 = vld [vmem:[%s526_s1] sm:$0xff] }
  0x19   :  { %207 = vmatpush1.bf16.msra.mxu0 %v206_v38  ;;  %269 = vmatpush1.bf16.msra.mxu1 %v206_v38  ;;  %v16_v38 = vld [vmem:[%s526_s1 + $0x10] sm:$0xff] }
  0x1a   :  { %209 = vmatprep.subr.bf16.mxu0 %v208_v40  ;;  %254 = vmatprep.subr.bf16.mxu1 %v208_v40 }
  0x1d   :  { %211 = vmatpush1.bf16.msra.mxu0 %v210_v47  ;;  %270 = vmatpush1.bf16.msra.mxu1 %v210_v47 }
  0x1e   :  { %213 = vmatprep.subr.bf16.mxu0 %v212_v49  ;;  %255 = vmatprep.subr.bf16.mxu1 %v212_v49 }
  0x21   :  { %215 = vmatpush1.bf16.msra.mxu0 %v214_v54  ;;  %271 = vmatpush1.bf16.msra.mxu1 %v214_v54 }
  0x22   :  { %217 = vmatprep.subr.bf16.mxu0 %v216_v55  ;;  %256 = vmatprep.subr.bf16.mxu1 %v216_v55 }
  0x25   :  { %219 = vmatpush1.bf16.msra.mxu0 %v218_v60  ;;  %272 = vmatpush1.bf16.msra.mxu1 %v218_v60 }
  0x26   :  { %221 = vmatprep.subr.bf16.mxu0 %v220_v61  ;;  %257 = vmatprep.subr.bf16.mxu1 %v220_v61 }
  0x29   :  { %223 = vmatpush1.bf16.msra.mxu0 %v222_v2  ;;  %273 = vmatpush1.bf16.msra.mxu1 %v222_v2 }
  0x2a   :  { %225 = vmatprep.subr.bf16.mxu0 %v224_v3  ;;  %258 = vmatprep.subr.bf16.mxu1 %v224_v3 }
  0x2d   :  { %227 = vmatpush1.bf16.msra.mxu0 %v226_v8  ;;  %274 = vmatpush1.bf16.msra.mxu1 %v226_v8 }
  0x2e   :  { %229 = vmatprep.subr.bf16.mxu0 %v228_v9  ;;  %259 = vmatprep.subr.bf16.mxu1 %v228_v9 }
  0x31   :  { %231 = vmatpush1.bf16.msra.mxu0 %v230_v14  ;;  %275 = vmatpush1.bf16.msra.mxu1 %v230_v14 }
  0x32   :  { %233 = vmatprep.subr.bf16.mxu0 %v232_v15  ;;  %260 = vmatprep.subr.bf16.mxu1 %v232_v15 }
  0x35   :  { %235 = vmatpush1.bf16.msra.mxu0 %v234_v20  ;;  %276 = vmatpush1.bf16.msra.mxu1 %v234_v20 }
  0x36   :  { %237 = vmatprep.subr.bf16.mxu0 %v236_v21  ;;  %261 = vmatprep.subr.bf16.mxu1 %v236_v21 }
  0x39   :  { %239 = vmatpush1.bf16.msra.mxu0 %v238_v26  ;;  %277 = vmatpush1.bf16.msra.mxu1 %v238_v26 }
  0x3a   :  { %241 = vmatprep.subr.bf16.mxu0 %v240_v27  ;;  %262 = vmatprep.subr.bf16.mxu1 %v240_v27 }
  0x3d   :  { %243 = vmatpush1.bf16.msra.mxu0 %v242_v32  ;;  %278 = vmatpush1.bf16.msra.mxu1 %v242_v32 }
  0x3e   :  { %245 = vmatprep.subr.bf16.mxu0 %v244_v33  ;;  %263 = vmatprep.subr.bf16.mxu1 %v244_v33 }
  0x41   :  { %247 = vmatpush1.bf16.msra.mxu0 %v246_v36  ;;  %279 = vmatpush1.bf16.msra.mxu1 %v246_v36 }
  0x44   :  { %159 = vmatmul.mubr.f32.vlgmr.msra.gmra.mrb[0].mxu0 %v14_v37  ;;  %165 = vmatmul.mubr.f32.vlgmr.msra.gmra.mrb[0].mxu1 %v16_v38 }
  0x8b   :  { %v87_v39 = vpop.permute.xlu0 %86 }
  0x8f   :  { %v92_v40 = vpop.permute.xlu0 %91 }
 0x117   :  { %v160_v41 = vpop.f32.mrb[0].mxu0  ;;  %v166_v42 = vpop.f32.mrb[0].mxu1 }
 0x118   :  { %v161_v43 = vadd.f32 %v160_v41, %v87_v39  ;;  %v167_v44 = vadd.f32 %v166_v42, %v92_v40  ;;  %v162_v45 = vpop.f32.mrb[1].mxu0  ;;  %v168_v46 = vpop.f32.mrb[1].mxu1 }
 0x119   :  { %v163_v47 = vadd.f32 %v162_v45, %v87_v39  ;;  %v169_v48 = vadd.f32 %v168_v46, %v92_v40 }
 0x11a   :  { %v171_v49 = vmax.f32 %v161_v43, 0.0  ;;  %v173_v50 = vmax.f32 %v167_v44, 0.0 }
 0x11b   :  { %v172_v51 = vmax.f32 %v163_v47, 0.0  ;;  %v174_v52 = vmax.f32 %v169_v48, 0.0 }
 0x11c   :  { %175 = vst [vmem:[%s528_s3] sm:$0xff] %v171_v49  ;;  %178 = vst [vmem:[%s528_s3 + $0x10] sm:$0xff] %v173_v50 }
 0x11d   :  { %177 = vst.msk [vmem:[%s528_s3 + $0x8] sm:$0xff] %vm176_vm0, %v172_v51  ;;  %179 = vst.msk [vmem:[%s528_s3 + $0x18] sm:$0xff] %vm176_vm0, %v174_v52 }

// kernel: simple_cnn_forward.5
= control target key start
LH: loop header
LB: loop body
LE: loop exit
PB: predicated region body
PF: predicated region fallthrough
CT: control target
= control target key end

     0   :  { %v732_v4 = vmov 0.0|0.0   ;;  %v733_v26 = vmov 1983009808   ;;  %v90_v28 = vlaneseq  ;;  %vm106_vm0 = vcmask 130048   ;;  %s1072_s0 = inlined_call_operand.vmem [shape: f32[2,400], index: 0, kind: input, shape index: {}]   ;;  %s1073_s1 = inlined_call_operand.vmem [shape: f32[400,128], index: 1, kind: input, shape index: {}]   ;;  %s1074_s2 = inlined_call_operand.vmem [shape: f32[1,128], index: 2, kind: input, shape index: {}]   ;;  %s1075_s3 = inlined_call_operand.vmem [shape: f32[128,128], index: 3, kind: input, shape index: {}]   ;;  %s1076_s4 = inlined_call_operand.vmem [shape: f32[1,128], index: 4, kind: input, shape index: {}]   ;;  %s1077_s5 = inlined_call_operand.vmem [shape: f32[128,128], index: 5, kind: input, shape index: {}]   ;;  %s1078_s6 = inlined_call_operand.vmem [shape: f32[1,128], index: 6, kind: input, shape index: {}]   ;;  %s1079_s7 = inlined_call_operand.hbm [shape: f32[2,128], index: 7, kind: output, shape index: {}]  }
   0x1   :  { %v44_v0 = vld [vmem:[%s1073_s1 + $0x80] sm:$0xff]  ;;  %v45_v1 = vld [vmem:[%s1073_s1 + $0x88] sm:$0xff]  ;;  %627 = vmatprep.subr.bf16.mxu1 %v732_v4  ;;  %v46_v10 = vld [vmem:[%s1073_s1 + $0x90] sm:$0xff]  ;;  %v88_v27 = vunpack.c.l.s4 %v733_v26 }
   0x2   :  { %v28_v2 = vld [vmem:[%s1073_s1] sm:$0xff]  ;;  %v595_v3 = vpack.c.bf16 %v45_v1, %v44_v0  ;;  %v29_v5 = vld [vmem:[%s1073_s1 + $0x8] sm:$0xff]  ;;  %v47_v11 = vld [vmem:[%s1073_s1 + $0x98] sm:$0xff]  ;;  %v91_v39 = vshrl.u32 %v90_v28, 7 }
   0x3   :  { %v60_v6 = vld [vmem:[%s1073_s1 + $0x100] sm:$0xff]  ;;  %v61_v7 = vld [vmem:[%s1073_s1 + $0x108] sm:$0xff]  ;;  %v597_v8 = vpack.c.bf16 %v29_v5, %v28_v2  ;;  %v30_v12 = vld [vmem:[%s1073_s1 + $0x10] sm:$0xff]  ;;  %v599_v13 = vpack.c.bf16 %v47_v11, %v46_v10  ;;  %v89_v38 = vunpack.c.0.s8 %v88_v27 }
   0x4   :  { %v628_v9 = vpack.c.bf16 %v61_v7, %v60_v6  ;;  %596 = vmatprep.subr.bf16.mxu0 %v595_v3  ;;  %v31_v14 = vld [vmem:[%s1073_s1 + $0x18] sm:$0xff]  ;;  %v62_v15 = vld [vmem:[%s1073_s1 + $0x110] sm:$0xff]  ;;  %v48_v19 = vld [vmem:[%s1073_s1 + $0xa0] sm:$0xff] }
   0x5   :  { %v63_v16 = vld [vmem:[%s1073_s1 + $0x118] sm:$0xff]  ;;  %598 = vmatpush3.bf16.msra.mxu0 %v597_v8  ;;  %v601_v17 = vpack.c.bf16 %v31_v14, %v30_v12  ;;  %v49_v20 = vld [vmem:[%s1073_s1 + $0xa8] sm:$0xff]  ;;  %v32_v21 = vld [vmem:[%s1073_s1 + $0x20] sm:$0xff]  ;;  %v92_v49 = vsub.s32 %v89_v38, %v91_v39 }
   0x6   :  { %629 = vmatpush1.bf16.msra.mxu1 %v628_v9  ;;  %v631_v18 = vpack.c.bf16 %v63_v16, %v62_v15  ;;  %600 = vmatprep.subr.bf16.mxu0 %v599_v13  ;;  %v603_v22 = vpack.c.bf16 %v49_v20, %v48_v19  ;;  %v33_v23 = vld [vmem:[%s1073_s1 + $0x28] sm:$0xff]  ;;  %v64_v24 = vld [vmem:[%s1073_s1 + $0x120] sm:$0xff]  ;;  %v50_v29 = vld [vmem:[%s1073_s1 + $0xb0] sm:$0xff] }
   0x7   :  { %630 = vmatprep.subr.bf16.mxu1 %v732_v4  ;;  %v65_v25 = vld [vmem:[%s1073_s1 + $0x128] sm:$0xff]  ;;  %v51_v30 = vld [vmem:[%s1073_s1 + $0xb8] sm:$0xff]  ;;  %v605_v31 = vpack.c.bf16 %v33_v23, %v32_v21  ;;  %v34_v33 = vld [vmem:[%s1073_s1 + $0x30] sm:$0xff] }
   0x8   :  { %v634_v32 = vpack.c.bf16 %v65_v25, %v64_v24  ;;  %v607_v34 = vpack.c.bf16 %v51_v30, %v50_v29  ;;  %v35_v35 = vld [vmem:[%s1073_s1 + $0x38] sm:$0xff]  ;;  %v66_v36 = vld [vmem:[%s1073_s1 + $0x130] sm:$0xff]  ;;  %v52_v40 = vld [vmem:[%s1073_s1 + $0xc0] sm:$0xff] }
   0x9   :  { %602 = vmatpush3.bf16.msra.mxu0 %v601_v17  ;;  %v67_v37 = vld [vmem:[%s1073_s1 + $0x138] sm:$0xff]  ;;  %v53_v41 = vld [vmem:[%s1073_s1 + $0xc8] sm:$0xff]  ;;  %v609_v42 = vpack.c.bf16 %v35_v35, %v34_v33  ;;  %v36_v44 = vld [vmem:[%s1073_s1 + $0x40] sm:$0xff] }
   0xa   :  { %632 = vmatpush1.bf16.msra.mxu1 %v631_v18  ;;  %604 = vmatprep.subr.bf16.mxu0 %v603_v22  ;;  %v637_v43 = vpack.c.bf16 %v67_v37, %v66_v36  ;;  %v611_v45 = vpack.c.bf16 %v53_v41, %v52_v40  ;;  %v37_v46 = vld [vmem:[%s1073_s1 + $0x48] sm:$0xff]  ;;  %v68_v47 = vld [vmem:[%s1073_s1 + $0x140] sm:$0xff]  ;;  %v54_v50 = vld [vmem:[%s1073_s1 + $0xd0] sm:$0xff] }
   0xb   :  { %633 = vmatprep.subr.bf16.mxu1 %v732_v4  ;;  %v69_v48 = vld [vmem:[%s1073_s1 + $0x148] sm:$0xff]  ;;  %v55_v51 = vld [vmem:[%s1073_s1 + $0xd8] sm:$0xff]  ;;  %v613_v52 = vpack.c.bf16 %v37_v46, %v36_v44  ;;  %v38_v54 = vld [vmem:[%s1073_s1 + $0x50] sm:$0xff] }
   0xc   :  { %v640_v53 = vpack.c.bf16 %v69_v48, %v68_v47  ;;  %v27_v55 = vld [vmem:[%s1072_s0] sm:$0xff]  ;;  %v615_v56 = vpack.c.bf16 %v55_v51, %v54_v50  ;;  %v39_v57 = vld [vmem:[%s1073_s1 + $0x58] sm:$0xff]  ;;  %v70_v58 = vld [vmem:[%s1073_s1 + $0x150] sm:$0xff] }
   0xd   :  { %606 = vmatpush3.bf16.msra.mxu0 %v605_v31  ;;  %v71_v59 = vld [vmem:[%s1073_s1 + $0x158] sm:$0xff]  ;;  %v86_v60 = vcombine.high %v27_v55, %v27_v55  ;;  %v93_v61 = vrot.slane %v27_v55, %v92_v49  ;;  %v56_v62 = vld [vmem:[%s1073_s1 + $0xe0] sm:$0xff]  ;;  %v57_v63 = vld [vmem:[%s1073_s1 + $0xe8] sm:$0xff]  ;;  %v617_v2 = vpack.c.bf16 %v39_v57, %v38_v54 }
   0xe   :  { %635 = vmatpush1.bf16.msra.mxu1 %v634_v32  ;;  %608 = vmatprep.subr.bf16.mxu0 %v607_v34  ;;  %v643_v3 = vpack.c.bf16 %v71_v59, %v70_v58  ;;  %v40_v5 = vld [vmem:[%s1073_s1 + $0x60] sm:$0xff]  ;;  %v41_v6 = vld [vmem:[%s1073_s1 + $0x68] sm:$0xff]  ;;  %v619_v7 = vpack.c.bf16 %v57_v63, %v56_v62 }
   0xf   :  { %636 = vmatprep.subr.bf16.mxu1 %v732_v4  ;;  %v101_v0 = vcombine.high %v93_v61, %v93_v61  ;;  %v100_v1 = vrot.slane %v86_v60, %v92_v49  ;;  %v72_v8 = vld [vmem:[%s1073_s1 + $0x160] sm:$0xff]  ;;  %v73_v9 = vld [vmem:[%s1073_s1 + $0x168] sm:$0xff] }
  0x11   :  { %610 = vmatpush3.bf16.msra.mxu0 %v609_v42  ;;  %v102_v10 = vcombine.high %v100_v1, %v100_v1 }
  0x12   :  { %638 = vmatpush1.bf16.msra.mxu1 %v637_v43  ;;  %612 = vmatprep.subr.bf16.mxu0 %v611_v45 }
  0x13   :  { %639 = vmatprep.subr.bf16.mxu1 %v732_v4 }
  0x15   :  { %614 = vmatpush3.bf16.msra.mxu0 %v613_v52 }
  0x16   :  { %641 = vmatpush1.bf16.msra.mxu1 %v640_v53  ;;  %616 = vmatprep.subr.bf16.mxu0 %v615_v56 }
  0x17   :  { %642 = vmatprep.subr.bf16.mxu1 %v732_v4 }
  0x18   :  { %12 = vsyncpa [#allocation3], 0  ;;  %v58_v11 = vld [vmem:[%s1073_s1 + $0xf0] sm:$0xff]  ;;  %v59_v12 = vld [vmem:[%s1073_s1 + $0xf8] sm:$0xff]  ;;  %173 = vmatprep.mubr.f32.mxu0 %v101_v0  ;;  %453 = vmatprep.mubr.msk.f32.mxu1 %vm106_vm0, %v102_v10  ;;  %v621_v13 = vpack.c.bf16 %v41_v6, %v40_v5  ;;  %v646_v14 = vpack.c.bf16 %v73_v9, %v72_v8  ;;  %vm734_vm1 = vmmov 0   ;;  %v735_v49 = vmov 0.0  }
  0x19   :  { %618 = vmatpush3.bf16.msra.mxu0 %v617_v2  ;;  %v42_v15 = vld [vmem:[%s1073_s1 + $0x70] sm:$0xff]  ;;  %v623_v16 = vpack.c.bf16 %v59_v12, %v58_v11  ;;  %v43_v17 = vld [vmem:[%s1073_s1 + $0x78] sm:$0xff]  ;;  %v76_v22 = vld [vmem:[%s1073_s1 + $0x180] sm:$0xff]  ;;  %s736_s25 = smov [#allocation2]  }
  0x1a   :  { %644 = vmatpush1.bf16.msra.mxu1 %v643_v3  ;;  %620 = vmatprep.subr.bf16.mxu0 %v619_v7  ;;  %v74_v18 = vld [vmem:[%s1073_s1 + $0x170] sm:$0xff]  ;;  %v75_v19 = vld [vmem:[%s1073_s1 + $0x178] sm:$0xff]  ;;  %v625_v20 = vpack.c.bf16 %v43_v17, %v42_v15  ;;  %v77_v23 = vld [vmem:[%s1073_s1 + $0x188] sm:$0xff]  ;;  %s444_s26 = sshll.u32 %s736_s25, 4  ;;  %s445_s26 = int_to_ptr.vmem [resolvable:$true] %s444_s26 }
  0x1b   :  { %645 = vmatprep.subr.bf16.mxu1 %v732_v4  ;;  %v649_v21 = vpack.c.bf16 %v75_v19, %v74_v18  ;;  %v250_v24 = vld [vmem:[%s1075_s3] sm:$0xff]  ;;  %v251_v25 = vld [vmem:[%s1075_s3 + $0x8] sm:$0xff]  ;;  %v652_v26 = vpack.c.bf16 %v77_v23, %v76_v22  ;;  %v252_v28 = vld [vmem:[%s1075_s3 + $0x10] sm:$0xff]  ;;  %p713_p1 = scmp.lt.s32.totalorder %s445_s26, %s445_s26 }
  0x1c   :  { %v655_v27 = vpack.c.bf16 %v251_v25, %v250_v24  ;;  %v253_v29 = vld [vmem:[%s1075_s3 + $0x18] sm:$0xff]  ;;  %v254_v31 = vld [vmem:[%s1075_s3 + $0x20] sm:$0xff]  ;;  %v255_v32 = vld [vmem:[%s1075_s3 + $0x28] sm:$0xff] }
  0x1d   :  { %622 = vmatpush3.bf16.msra.mxu0 %v621_v13  ;;  %v658_v30 = vpack.c.bf16 %v253_v29, %v252_v28  ;;  %v661_v33 = vpack.c.bf16 %v255_v32, %v254_v31  ;;  %v256_v34 = vld [vmem:[%s1075_s3 + $0x30] sm:$0xff]  ;;  %v257_v35 = vld [vmem:[%s1075_s3 + $0x38] sm:$0xff]  ;;  %v258_v37 = vld [vmem:[%s1075_s3 + $0x40] sm:$0xff] }
  0x1e   :  { %647 = vmatpush1.bf16.msra.mxu1 %v646_v14  ;;  %624 = vmatprep.subr.bf16.mxu0 %v623_v16  ;;  %v664_v36 = vpack.c.bf16 %v257_v35, %v256_v34  ;;  %v259_v38 = vld [vmem:[%s1075_s3 + $0x48] sm:$0xff]  ;;  %v260_v40 = vld [vmem:[%s1075_s3 + $0x50] sm:$0xff]  ;;  %v261_v41 = vld [vmem:[%s1075_s3 + $0x58] sm:$0xff] }
  0x1f   :  { %648 = vmatprep.subr.bf16.mxu1 %v732_v4  ;;  %v667_v39 = vpack.c.bf16 %v259_v38, %v258_v37  ;;  %v670_v42 = vpack.c.bf16 %v261_v41, %v260_v40  ;;  %v262_v43 = vld [vmem:[%s1075_s3 + $0x60] sm:$0xff]  ;;  %v263_v44 = vld [vmem:[%s1075_s3 + $0x68] sm:$0xff]  ;;  %v264_v46 = vld [vmem:[%s1075_s3 + $0x70] sm:$0xff] }
  0x20   :  { %v673_v45 = vpack.c.bf16 %v263_v44, %v262_v43  ;;  %v265_v47 = vld [vmem:[%s1075_s3 + $0x78] sm:$0xff]  ;;  %v344_v50 = vld [vmem:[%s1077_s5] sm:$0xff]  ;;  %v345_v51 = vld [vmem:[%s1077_s5 + $0x8] sm:$0xff] }
  0x21   :  { %626 = vmatpush3.bf16.msra.mxu0 %v625_v20  ;;  %v676_v48 = vpack.c.bf16 %v265_v47, %v264_v46  ;;  %v346_v52 = vld [vmem:[%s1077_s5 + $0x10] sm:$0xff]  ;;  %v679_v53 = vpack.c.bf16 %v345_v51, %v344_v50  ;;  %v347_v54 = vld [vmem:[%s1077_s5 + $0x18] sm:$0xff]  ;;  %v348_v56 = vld [vmem:[%s1077_s5 + $0x20] sm:$0xff] }
  0x22   :  { %650 = vmatpush1.bf16.msra.mxu1 %v649_v21  ;;  %654 = vmatprep.subr.bf16.mxu0 %v732_v4  ;;  %v682_v55 = vpack.c.bf16 %v347_v54, %v346_v52  ;;  %v349_v57 = vld [vmem:[%s1077_s5 + $0x28] sm:$0xff]  ;;  %v350_v59 = vld [vmem:[%s1077_s5 + $0x30] sm:$0xff]  ;;  %v351_v60 = vld [vmem:[%s1077_s5 + $0x38] sm:$0xff] }
  0x23   :  { %651 = vmatprep.subr.bf16.mxu1 %v732_v4  ;;  %v685_v58 = vpack.c.bf16 %v349_v57, %v348_v56  ;;  %v352_v62 = vld [vmem:[%s1077_s5 + $0x40] sm:$0xff]  ;;  %v353_v63 = vld [vmem:[%s1077_s5 + $0x48] sm:$0xff]  ;;  %v355_v2 = vld [vmem:[%s1077_s5 + $0x58] sm:$0xff] }
  0x24   :  { %174 = vmatmul.mubr.f32.vlgmr.msra.gmra.mrb[0].mxu0 %v93_v61  ;;  %v688_v61 = vpack.c.bf16 %v351_v60, %v350_v59  ;;  %v691_v0 = vpack.c.bf16 %v353_v63, %v352_v62  ;;  %v356_v5 = vld [vmem:[%s1077_s5 + $0x60] sm:$0xff]  ;;  %v357_v6 = vld [vmem:[%s1077_s5 + $0x68] sm:$0xff]  ;;  %v358_v17 = vld [vmem:[%s1077_s5 + $0x70] sm:$0xff] }
  0x25   :  { %656 = vmatpush3.bf16.msra.mxu0 %v655_v27  ;;  %557 = vmatprep.mubr.msk.f32.mxu0 %vm734_vm1, %v735_v49  ;;  %v697_v7 = vpack.c.bf16 %v357_v6, %v356_v5  ;;  %v452_v10 = vld [vmem:[%s1074_s2] ss:$0 sm:$0xff] }
  0x26   :  { %653 = vmatpush1.bf16.msra.mxu1 %v652_v26  ;;  %657 = vmatprep.subr.bf16.mxu0 %v732_v4  ;;  %v454_v19 = vld [vmem:[%s1076_s4] ss:$0 sm:$0xff] }
  0x27   :  { %678 = vmatprep.subr.bf16.mxu1 %v732_v4  ;;  %v455_v24 = vld [vmem:[%s1078_s6] ss:$0 sm:$0xff] }
  0x29   :  { %244 = vmatmul.mubr.f32.vlgmr.msra.gmra.mrb[0].mxu1 %v100_v1  ;;  %659 = vmatpush3.bf16.msra.mxu0 %v658_v30  ;;  %v354_v1 = vld [vmem:[%s1077_s5 + $0x50] sm:$0xff] }
  0x2a   :  { %660 = vmatprep.subr.bf16.mxu0 %v732_v4  ;;  %592 = vmatprep.mubr.msk.f32.mxu1 %vm734_vm1, %v735_v49  ;;  %v694_v3 = vpack.c.bf16 %v355_v2, %v354_v1 }
  0x2b   :  { %680 = vmatpush3.bf16.msra.mxu1 %v679_v53 }
  0x2c   :  { %681 = vmatprep.subr.bf16.mxu1 %v732_v4 }
  0x2d   :  { %662 = vmatpush3.bf16.msra.mxu0 %v661_v33 }
  0x2e   :  { %663 = vmatprep.subr.bf16.mxu0 %v732_v4 }
  0x2f   :  { %683 = vmatpush3.bf16.msra.mxu1 %v682_v55 }
  0x30   :  { %684 = vmatprep.subr.bf16.mxu1 %v732_v4 }
  0x31   :  { %665 = vmatpush3.bf16.msra.mxu0 %v664_v36 }
  0x32   :  { %666 = vmatprep.subr.bf16.mxu0 %v732_v4 }
  0x33   :  { %686 = vmatpush3.bf16.msra.mxu1 %v685_v58 }
  0x34   :  { %687 = vmatprep.subr.bf16.mxu1 %v732_v4 }
  0x35   :  { %668 = vmatpush3.bf16.msra.mxu0 %v667_v39 }
  0x36   :  { %669 = vmatprep.subr.bf16.mxu0 %v732_v4 }
  0x37   :  { %689 = vmatpush3.bf16.msra.mxu1 %v688_v61 }
  0x38   :  { %690 = vmatprep.subr.bf16.mxu1 %v732_v4 }
  0x39   :  { %671 = vmatpush3.bf16.msra.mxu0 %v670_v42 }
  0x3a   :  { %672 = vmatprep.subr.bf16.mxu0 %v732_v4 }
  0x3b   :  { %692 = vmatpush3.bf16.msra.mxu1 %v691_v0 }
  0x3c   :  { %693 = vmatprep.subr.bf16.mxu1 %v732_v4 }
  0x3d   :  { %674 = vmatpush3.bf16.msra.mxu0 %v673_v45 }
  0x3e   :  { %675 = vmatprep.subr.bf16.mxu0 %v732_v4 }
  0x3f   :  { %695 = vmatpush3.bf16.msra.mxu1 %v694_v3 }
  0x40   :  { %696 = vmatprep.subr.bf16.mxu1 %v732_v4 }
  0x41   :  { %677 = vmatpush3.bf16.msra.mxu0 %v676_v48 }
  0x43   :  { %698 = vmatpush3.bf16.msra.mxu1 %v697_v7 }
  0x44   :  { %699 = vmatprep.subr.bf16.mxu1 %v732_v4  ;;  %v359_v4 = vld [vmem:[%s1077_s5 + $0x78] sm:$0xff]  ;;  %s708_s5 = scalar_lea.vmem %s445_s26, 32 }
  0x45   :  { %v700_v18 = vpack.c.bf16 %v359_v4, %v358_v17  ;;  %p709_p0 = scmp.ne.s32.totalorder %s445_s26, %s708_s5  ;;  %p714_p2 = scmp.lt.s32.totalorder %s708_s5, %s708_s5 }
  0x47   :  { %701 = vmatpush3.bf16.msra.mxu1 %v700_v18  ;;  %p715_p3 = por %p714_p2, %p713_p1 }
  0x49   :  { %p716_p4 = pnand %p715_p3, %p709_p0 }
  0xf7   :  { %v488_v8 = vpop.f32.mrb[0].mxu0 }
  0xf8   :  { %v489_v9 = vpop.f32.mrb[1].mxu0 }
  0xf9   :  { %v490_v11 = vadd.f32 %v489_v9, %v488_v8 }
  0xfb   :  { %v176_v12 = vadd.f32 %v490_v11, %v452_v10 }
  0xfc   :  { %v245_v13 = vpop.f32.mrb[0].mxu1 }
  0xfd   :  { %v247_v14 = vpop.f32.mrb[1].mxu1  ;;  %v246_v15 = vadd.f32 %v245_v13, %v176_v12 }
  0xff   :  { %v249_v16 = vmax.f32 %v246_v15, 0.0 }
 0x101   :  { %558 = vmatmul.mubr.f32.vlgmr.msra.gmra.mrb[2].mxu0 %v249_v16 }
 0x1d4   :  { %v339_v20 = vpop.f32.mrb[2].mxu0 }
 0x1d5   :  { %v340_v21 = vadd.f32 %v454_v19, %v339_v20  ;;  %v559_v22 = vpop.f32.mrb[3].mxu0 }
 0x1d7   :  { %v343_v23 = vmax.f32 %v340_v21, 0.0 }
 0x1d9   :  { %593 = vmatmul.mubr.f32.vlgmr.msra.gmra.mrb[2].mxu1 %v343_v23 }
 0x2ac   :  { %v433_v25 = vpop.f32.mrb[2].mxu1 }
 0x2ad   :  { %v434_v26 = vadd.f32 %v455_v24, %v433_v25  ;;  %v594_v27 = vpop.f32.mrb[3].mxu1 }
 0x2af   :  { %437 = vst [vmem:[#allocation2] sm:$0x3] %v434_v26 }
 0x2b0   :  { %719 = shalt.err (!%p716_p4)
}
 0x2b1   :  { %s720_s28 = scalar_lea.hbm %s1079_s7, 32 }
 0x2b2   :  { %p721_p5 = scmp.ne.s32.totalorder %s1079_s7, %s720_s28  ;;  %p724_p6 = scmp.lt.u32.totalorder %s720_s28, %s1079_s7 }
 0x2b4   :  { %p726_p7 = pnand %p724_p6, %p721_p5 }
 0x2b6   :  { %729 = shalt.err (!%p726_p7)
}
 0x2b7   :  { %447 = dma.vmem_to_hbm [thread:$0]  %s445_s26, 32, %s1079_s7, [#allocation3]  }
 0x2b8   :  { %730 = dma.done.wait [#allocation3], 32  }
 0x2b9   :  { %731 = vsyncadd [#allocation3], 4294967264 }
 0x2ba   :  { %451 = vsyncpa [#allocation3], 1 }

</bundles_post_ra>
